<compile_context>
chip_gen: v7x
topology: tpu7x:2x2x1
jax: 0.10.0
libtpu: 0.0.40
codegen_flags: <defaults>
</compile_context>

<pallas_src>
import functools

import jax
import jax.numpy as jnp
from jax.experimental import pallas as pl
from jax.experimental.pallas import tpu as pltpu


# ----------------------------- helpers -------------------------------------


def _layernorm(x, g, b, eps=1e-5):
    mu = jnp.mean(x, axis=-1, keepdims=True)
    d = x - mu
    var = jnp.mean(d * d, axis=-1, keepdims=True)   # biased variance (PyTorch)
    return d * jax.lax.rsqrt(var + eps) * g + b


# ----------------------------- fused kernel ---------------------------------


def fused_forward_kernel(
        x_ref,
        wqkv_ref, bqkv_ref, wo_ref, bo_ref, g1_ref, be1_ref,
        w1_ref, b1_ref, w2_ref, b2_ref, g2_ref, be2_ref,
        gf_ref, bf_ref,
        o_ref, *, num_layers, num_heads, batch):
    rows, H = x_ref.shape                       # rows = B*S, lane-dense slab
    S = rows // batch
    hd = H // num_heads
    scale = 1.0 / float(hd) ** 0.5
    bf16 = jnp.bfloat16

    x_all = x_ref[...]                          # (B*S, H) f32
    x_bf = x_all.astype(bf16)

    out_all = x_all
    for l in range(num_layers):                 # static layer loop (usually 1)
        # ---- fused QKV projection: one (B*S,H) @ (H,3H) MXU push ----------
        qkv = jnp.dot(x_bf, wqkv_ref[l],
                      preferred_element_type=jnp.float32) + bqkv_ref[l]

        head_outs = []
        for h in range(num_heads):              # static head loop
            q = qkv[:, h * hd:(h + 1) * hd] * scale
            k = qkv[:, H + h * hd: H + (h + 1) * hd]
            v = qkv[:, 2 * H + h * hd: 2 * H + (h + 1) * hd]
            qb = q.reshape(batch, S, hd)        # sublane-axis split, no movement
            kb = k.reshape(batch, S, hd)
            vb = v.reshape(batch, S, hd)
            # batched attention over B: one MXU contraction per head
            s = jnp.einsum('bqd,bkd->bqk', qb.astype(bf16), kb.astype(bf16),
                           preferred_element_type=jnp.float32)
            s = s - jnp.max(s, axis=-1, keepdims=True)
            p = jnp.exp(s)
            p = p / jnp.sum(p, axis=-1, keepdims=True)     # exact divide
            o_h = jnp.einsum('bqk,bkd->bqd', p.astype(bf16), vb.astype(bf16),
                             preferred_element_type=jnp.float32)
            head_outs.append(o_h.reshape(rows, hd))

        # ---- fused output projection: one (B*S,H) @ (H,H) MXU push --------
        attn = jnp.concatenate(head_outs, axis=-1)          # (B*S, H)
        attn = jnp.dot(attn.astype(bf16), wo_ref[l],
                       preferred_element_type=jnp.float32) + bo_ref[l]

        # ---- post-norm residual + FFN (f32 elementwise, bf16 matmul in) ----
        y = _layernorm(x_all + attn, g1_ref[l], be1_ref[l])
        ff = jnp.maximum(
            jnp.dot(y.astype(bf16), w1_ref[l],
                    preferred_element_type=jnp.float32) + b1_ref[l], 0.0)
        ff = jnp.dot(ff.astype(bf16), w2_ref[l],
                     preferred_element_type=jnp.float32) + b2_ref[l]
        out_all = _layernorm(y + ff, g2_ref[l], be2_ref[l])

    # final LayerNorm + single lane-dense full-block store
    o_ref[...] = _layernorm(out_all, gf_ref[...], bf_ref[...])


# ----------------------------- wrapper --------------------------------------


_KP_ORDER = ("wqkv", "bqkv", "wo", "bo", "g1", "be1",
             "w1", "b1", "w2", "b2", "g2", "be2", "gf", "bf")


def diffusion_transformer_forward(kparams, x, audio, gaze, dist, emo,
                                  num_heads, compute_dead_layers=False):
    """Inputs are (S, B, d_i); returns (S, B, H), like the PyTorch module."""
    S, B, _ = x.shape
    H = kparams["gf"].shape[-1]
    L = kparams["wqkv"].shape[0]

    # Feature concat + (S,B,*) -> lane-dense (B*S,H) slab: wrapper-side XLA
    # layout plumbing (single fused concat/transpose), kernel sees one slab.
    inp = jnp.concatenate([x, audio, gaze, dist, emo], axis=-1)       # (S,B,H)
    x_slab = jnp.transpose(inp, (1, 0, 2)).reshape(B * S, H).astype(jnp.float32)

    kp = dict(kparams)
    if not compute_dead_layers:
        # Only the last layer's output feeds the final LayerNorm (PyTorch
        # overwrites x each iteration) -> don't DMA dead layers' weights.
        for n in _KP_ORDER[:-2]:
            kp[n] = kp[n][L - 1:]
        num_layers = 1
    else:
        num_layers = L

    operands = [x_slab] + [kp[n] for n in _KP_ORDER]

    def full_spec(a):
        nd = a.ndim
        return pl.BlockSpec(a.shape, lambda i, nd=nd: (0,) * nd)

    kernel = functools.partial(
        fused_forward_kernel, num_layers=num_layers,
        num_heads=num_heads, batch=B)

    out = pl.pallas_call(
        kernel,
        out_shape=jax.ShapeDtypeStruct((B * S, H), jnp.float32),
        grid=(1,),
        in_specs=[full_spec(a) for a in operands],
        out_specs=pl.BlockSpec((B * S, H), lambda i: (0, 0)),
        compiler_params=pltpu.CompilerParams(
            dimension_semantics=("arbitrary",)),
    )(*operands)

    # back to the PyTorch (S, B, H) layout (wrapper-side, lane-dense store above)
    return jnp.transpose(out.reshape(B, S, H), (1, 0, 2))


# ----------------------------- params --------------------------------------


def init_params(key, num_layers, hidden):
    """PyTorch-format parameters (used by the pure-JAX reference)."""
    def u(k, shape):
        return jax.random.uniform(k, shape, jnp.float32, -0.1, 0.1)

    layers = []
    for _ in range(num_layers):
        key, *ks = jax.random.split(key, 9)
        in_proj_w = u(ks[0], (3 * hidden, hidden))   # PyTorch (out, in)
        in_proj_b = u(ks[1], (3 * hidden,))
        out_w = u(ks[2], (hidden, hidden))
        out_b = u(ks[3], (hidden,))
        lin1_w = u(ks[4], (hidden, hidden))          # dim_feedforward == hidden_size
        lin1_b = u(ks[5], (hidden,))
        lin2_w = u(ks[6], (hidden, hidden))
        lin2_b = u(ks[7], (hidden,))
        layers.append(dict(
            wqkv=in_proj_w.T, bqkv=in_proj_b.reshape(1, -1),
            wo=out_w.T, bo=out_b.reshape(1, -1),
            g1=jnp.ones((1, hidden), jnp.float32),
            be1=jnp.zeros((1, hidden), jnp.float32),
            w1=lin1_w.T, b1=lin1_b.reshape(1, -1),
            w2=lin2_w.T, b2=lin2_b.reshape(1, -1),
            g2=jnp.ones((1, hidden), jnp.float32),
            be2=jnp.zeros((1, hidden), jnp.float32),
        ))
    return dict(layers=layers,
                norm_g=jnp.ones((1, hidden), jnp.float32),
                norm_b=jnp.zeros((1, hidden), jnp.float32))


def prep_kernel_params(params, matmul_dtype=jnp.bfloat16):
    """One-time host-side prep: stack layers, keep weights fused & lane-dense,
    store matmul operands in bf16 (f32 accumulation in-kernel)."""
    def stack(fn):
        return jnp.stack([fn(lp) for lp in params["layers"]], axis=0)

    return dict(
        wqkv=stack(lambda lp: lp["wqkv"]).astype(matmul_dtype),   # (L, H, 3H)
        bqkv=stack(lambda lp: lp["bqkv"]),                        # (L, 1, 3H) f32
        wo=stack(lambda lp: lp["wo"]).astype(matmul_dtype),       # (L, H, H)
        bo=stack(lambda lp: lp["bo"]),
        g1=stack(lambda lp: lp["g1"]), be1=stack(lambda lp: lp["be1"]),
        w1=stack(lambda lp: lp["w1"]).astype(matmul_dtype),
        b1=stack(lambda lp: lp["b1"]),
        w2=stack(lambda lp: lp["w2"]).astype(matmul_dtype),
        b2=stack(lambda lp: lp["b2"]),
        g2=stack(lambda lp: lp["g2"]), be2=stack(lambda lp: lp["be2"]),
        gf=params["norm_g"], bf=params["norm_b"],
    )


# ----------------------------- reference (pure JAX, f32) ---------------------


def _ref_layer(x_bsh, p, num_heads):
    B, S, H = x_bsh.shape
    hd = H // num_heads
    qkv = x_bsh @ p["wqkv"] + p["bqkv"]
    q = qkv[..., :H] * (1.0 / float(hd) ** 0.5)
    k = qkv[..., H:2 * H]
    v = qkv[..., 2 * H:]
    q = q.reshape(B, S, num_heads, hd).transpose(0, 2, 1, 3)
    k = k.reshape(B, S, num_heads, hd).transpose(0, 2, 1, 3)
    v = v.reshape(B, S, num_heads, hd).transpose(0, 2, 1, 3)
    a = jax.nn.softmax(q @ jnp.swapaxes(k, -1, -2), axis=-1) @ v
    a = a.transpose(0, 2, 1, 3).reshape(B, S, H) @ p["wo"] + p["bo"]
    y = _layernorm(x_bsh + a, p["g1"], p["be1"])
    f = jnp.maximum(y @ p["w1"] + p["b1"], 0.0) @ p["w2"] + p["b2"]
    return _layernorm(y + f, p["g2"], p["be2"])


def _ref_forward(params, x, audio, gaze, dist, emo, num_heads):
    inp = jnp.transpose(jnp.concatenate([x, audio, gaze, dist, emo], axis=-1),
                        (1, 0, 2))
    out = inp
    for lp in params["layers"]:
        out = _ref_layer(inp, lp, num_heads)   # every layer reads input_features
    out = _layernorm(out, params["norm_g"], params["norm_b"])
    return jnp.transpose(out, (1, 0, 2))


# ----------------------------- main -----------------------------------------


if __name__ == "__main__":
    num_layers, num_heads, hidden = 2, 4, 32
    S, B = 8, 2
    # last-dim sizes of the five concatenated inputs must sum to hidden_size
    d_x, d_a, d_g, d_h, d_e = 16, 8, 3, 1, 4

    key = jax.random.PRNGKey(0)
    kx, ka, kg, kd, ke, kp = jax.random.split(key, 6)
    x = jax.random.normal(kx, (S, B, d_x), jnp.float32)
    audio = jax.random.normal(ka, (S, B, d_a), jnp.float32)
    gaze = jax.random.normal(kg, (S, B, d_g), jnp.float32)
    dist = jax.random.normal(kd, (S, B, d_h), jnp.float32)
    emo = jax.random.normal(ke, (S, B, d_e), jnp.float32)

    params = init_params(kp, num_layers, hidden)
    kparams = prep_kernel_params(params, num_heads and jnp.bfloat16)

    out = diffusion_transformer_forward(kparams, x, audio, gaze, dist, emo, num_heads)
    out = jax.block_until_ready(out)
    assert out.shape == (S, B, hidden)

    ref = jax.block_until_ready(_ref_forward(params, x, audio, gaze, dist, emo, num_heads))
    # Tolerance absorbs bf16 matmul operands (f32 accumulation, f32 reference);
    # anything structurally wrong produces O(0.1-1) errors.
    max_err = float(jnp.max(jnp.abs(out - ref)))
    if max_err > 5e-2:
        raise RuntimeError(f"mismatch vs reference, max_err={max_err}")

    print("KERNEL_OK")
</pallas_src>

<mosaic_0001>
module attributes {stable_mosaic.version = 11 : i64} {
  func.func @fused_forward_kernel(%arg0: i32, %arg1: memref<16x32xf32, #tpu.memory_space<vmem>>, %arg2: memref<1x32x96xbf16, #tpu.memory_space<vmem>>, %arg3: memref<1x1x96xf32, #tpu.memory_space<vmem>>, %arg4: memref<1x32x32xbf16, #tpu.memory_space<vmem>>, %arg5: memref<1x1x32xf32, #tpu.memory_space<vmem>>, %arg6: memref<1x1x32xf32, #tpu.memory_space<vmem>>, %arg7: memref<1x1x32xf32, #tpu.memory_space<vmem>>, %arg8: memref<1x32x32xbf16, #tpu.memory_space<vmem>>, %arg9: memref<1x1x32xf32, #tpu.memory_space<vmem>>, %arg10: memref<1x32x32xbf16, #tpu.memory_space<vmem>>, %arg11: memref<1x1x32xf32, #tpu.memory_space<vmem>>, %arg12: memref<1x1x32xf32, #tpu.memory_space<vmem>>, %arg13: memref<1x1x32xf32, #tpu.memory_space<vmem>>, %arg14: memref<1x32xf32, #tpu.memory_space<vmem>>, %arg15: memref<1x32xf32, #tpu.memory_space<vmem>>, %arg16: memref<16x32xf32, #tpu.memory_space<vmem>>) attributes {dimension_semantics = [#tpu.dimension_semantics<arbitrary>], iteration_bounds = array<i64: 1>, scalar_prefetch = 0 : i64, scratch_operands = 0 : i64, tpu.core_type = #tpu.core_type<tc>, window_params = [{pipeline_mode = #tpu.pipeline_mode<synchronous>, transform_indices = @transform_0, window_bounds = array<i64: 16, 32>}, {pipeline_mode = #tpu.pipeline_mode<synchronous>, transform_indices = @transform_1, window_bounds = array<i64: 1, 32, 96>}, {pipeline_mode = #tpu.pipeline_mode<synchronous>, transform_indices = @transform_2, window_bounds = array<i64: 1, 1, 96>}, {pipeline_mode = #tpu.pipeline_mode<synchronous>, transform_indices = @transform_3, window_bounds = array<i64: 1, 32, 32>}, {pipeline_mode = #tpu.pipeline_mode<synchronous>, transform_indices = @transform_4, window_bounds = array<i64: 1, 1, 32>}, {pipeline_mode = #tpu.pipeline_mode<synchronous>, transform_indices = @transform_5, window_bounds = array<i64: 1, 1, 32>}, {pipeline_mode = #tpu.pipeline_mode<synchronous>, transform_indices = @transform_6, window_bounds = array<i64: 1, 1, 32>}, {pipeline_mode = #tpu.pipeline_mode<synchronous>, transform_indices = @transform_7, window_bounds = array<i64: 1, 32, 32>}, {pipeline_mode = #tpu.pipeline_mode<synchronous>, transform_indices = @transform_8, window_bounds = array<i64: 1, 1, 32>}, {pipeline_mode = #tpu.pipeline_mode<synchronous>, transform_indices = @transform_9, window_bounds = array<i64: 1, 32, 32>}, {pipeline_mode = #tpu.pipeline_mode<synchronous>, transform_indices = @transform_10, window_bounds = array<i64: 1, 1, 32>}, {pipeline_mode = #tpu.pipeline_mode<synchronous>, transform_indices = @transform_11, window_bounds = array<i64: 1, 1, 32>}, {pipeline_mode = #tpu.pipeline_mode<synchronous>, transform_indices = @transform_12, window_bounds = array<i64: 1, 1, 32>}, {pipeline_mode = #tpu.pipeline_mode<synchronous>, transform_indices = @transform_13, window_bounds = array<i64: 1, 32>}, {pipeline_mode = #tpu.pipeline_mode<synchronous>, transform_indices = @transform_14, window_bounds = array<i64: 1, 32>}, {pipeline_mode = #tpu.pipeline_mode<synchronous>, transform_indices = @transform_15, window_bounds = array<i64: 16, 32>}]} {
    %c0 = arith.constant 0 : index
    %c0_0 = arith.constant 0 : index
    %0 = vector.load %arg1[%c0, %c0_0] : memref<16x32xf32, #tpu.memory_space<vmem>>, vector<16x32xf32>
    %1 = arith.truncf %0 : vector<16x32xf32> to vector<16x32xbf16>
    %c0_1 = arith.constant 0 : index
    %c0_2 = arith.constant 0 : index
    %c0_3 = arith.constant 0 : index
    %2 = vector.load %arg2[%c0_1, %c0_2, %c0_3] : memref<1x32x96xbf16, #tpu.memory_space<vmem>>, vector<1x32x96xbf16>
    %3 = vector.shape_cast %2 : vector<1x32x96xbf16> to vector<32x96xbf16>
    %cst = arith.constant dense<0.000000e+00> : vector<16x96xf32>
    %4 = tpu.matmul %1, %3, %cst {dimension_numbers = #tpu.dot_dimension_numbers<[1], [0], [0], [1], [0, 0, 1, 1], [], []>} : vector<16x32xbf16>, vector<32x96xbf16>, vector<16x96xf32> -> vector<16x96xf32>
    %c0_4 = arith.constant 0 : index
    %c0_5 = arith.constant 0 : index
    %c0_6 = arith.constant 0 : index
    %5 = vector.load %arg3[%c0_4, %c0_5, %c0_6] : memref<1x1x96xf32, #tpu.memory_space<vmem>>, vector<1x1x96xf32>
    %6 = vector.shape_cast %5 : vector<1x1x96xf32> to vector<1x96xf32>
    %7 = vector.broadcast %6 : vector<1x96xf32> to vector<16x96xf32>
    %8 = arith.addf %4, %7 : vector<16x96xf32>
    %9 = vector.extract_strided_slice %8 {offsets = [0, 0], sizes = [16, 8], strides = [1, 1]} : vector<16x96xf32> to vector<16x8xf32>
    %cst_7 = arith.constant 0.353553385 : f32
    %10 = vector.broadcast %cst_7 : f32 to vector<16x8xf32>
    %11 = arith.mulf %9, %10 : vector<16x8xf32>
    %12 = vector.extract_strided_slice %8 {offsets = [0, 32], sizes = [16, 8], strides = [1, 1]} : vector<16x96xf32> to vector<16x8xf32>
    %13 = vector.extract_strided_slice %8 {offsets = [0, 64], sizes = [16, 8], strides = [1, 1]} : vector<16x96xf32> to vector<16x8xf32>
    %14 = vector.shape_cast %11 : vector<16x8xf32> to vector<2x8x8xf32>
    %15 = vector.shape_cast %12 : vector<16x8xf32> to vector<2x8x8xf32>
    %16 = vector.shape_cast %13 : vector<16x8xf32> to vector<2x8x8xf32>
    %17 = arith.truncf %14 : vector<2x8x8xf32> to vector<2x8x8xbf16>
    %18 = arith.truncf %15 : vector<2x8x8xf32> to vector<2x8x8xbf16>
    "tpu.trace_start"() <{level = 10 : i32, message = "bqd,bkd->bqk"}> : () -> ()
    %cst_8 = arith.constant dense<0.000000e+00> : vector<2x8x8xf32>
    %19 = tpu.matmul %17, %18, %cst_8 {dimension_numbers = #tpu.dot_dimension_numbers<[2], [2], [1], [1], [0, 0, 0, 1, 1, 1], [0], [0]>} : vector<2x8x8xbf16>, vector<2x8x8xbf16>, vector<2x8x8xf32> -> vector<2x8x8xf32>
    "tpu.trace_stop"() : () -> ()
    %cst_9 = arith.constant dense<0xFF800000> : vector<2x8xf32>
    %20 = vector.multi_reduction <maximumf>, %19, %cst_9 [2] : vector<2x8x8xf32> to vector<2x8xf32>
    %21 = vector.shape_cast %20 : vector<2x8xf32> to vector<2x8x1xf32>
    %22 = vector.broadcast %21 : vector<2x8x1xf32> to vector<2x8x8xf32>
    %23 = arith.subf %19, %22 : vector<2x8x8xf32>
    %24 = math.exp %23 : vector<2x8x8xf32>
    %cst_10 = arith.constant dense<0.000000e+00> : vector<2x8xf32>
    %25 = vector.multi_reduction <add>, %24, %cst_10 [2] : vector<2x8x8xf32> to vector<2x8xf32>
    %26 = vector.shape_cast %25 : vector<2x8xf32> to vector<2x8x1xf32>
    %27 = vector.broadcast %26 : vector<2x8x1xf32> to vector<2x8x8xf32>
    %28 = arith.divf %24, %27 : vector<2x8x8xf32>
    %29 = arith.truncf %28 : vector<2x8x8xf32> to vector<2x8x8xbf16>
    %30 = arith.truncf %16 : vector<2x8x8xf32> to vector<2x8x8xbf16>
    "tpu.trace_start"() <{level = 10 : i32, message = "bqk,bkd->bqd"}> : () -> ()
    %cst_11 = arith.constant dense<0.000000e+00> : vector<2x8x8xf32>
    %31 = tpu.matmul %29, %30, %cst_11 {dimension_numbers = #tpu.dot_dimension_numbers<[2], [1], [1], [2], [0, 0, 0, 1, 1, 2], [0], [0]>} : vector<2x8x8xbf16>, vector<2x8x8xbf16>, vector<2x8x8xf32> -> vector<2x8x8xf32>
    "tpu.trace_stop"() : () -> ()
    %32 = vector.shape_cast %31 : vector<2x8x8xf32> to vector<16x8xf32>
    %33 = vector.extract_strided_slice %8 {offsets = [0, 8], sizes = [16, 8], strides = [1, 1]} : vector<16x96xf32> to vector<16x8xf32>
    %cst_12 = arith.constant 0.353553385 : f32
    %34 = vector.broadcast %cst_12 : f32 to vector<16x8xf32>
    %35 = arith.mulf %33, %34 : vector<16x8xf32>
    %36 = vector.extract_strided_slice %8 {offsets = [0, 40], sizes = [16, 8], strides = [1, 1]} : vector<16x96xf32> to vector<16x8xf32>
    %37 = vector.extract_strided_slice %8 {offsets = [0, 72], sizes = [16, 8], strides = [1, 1]} : vector<16x96xf32> to vector<16x8xf32>
    %38 = vector.shape_cast %35 : vector<16x8xf32> to vector<2x8x8xf32>
    %39 = vector.shape_cast %36 : vector<16x8xf32> to vector<2x8x8xf32>
    %40 = vector.shape_cast %37 : vector<16x8xf32> to vector<2x8x8xf32>
    %41 = arith.truncf %38 : vector<2x8x8xf32> to vector<2x8x8xbf16>
    %42 = arith.truncf %39 : vector<2x8x8xf32> to vector<2x8x8xbf16>
    "tpu.trace_start"() <{level = 10 : i32, message = "bqd,bkd->bqk"}> : () -> ()
    %cst_13 = arith.constant dense<0.000000e+00> : vector<2x8x8xf32>
    %43 = tpu.matmul %41, %42, %cst_13 {dimension_numbers = #tpu.dot_dimension_numbers<[2], [2], [1], [1], [0, 0, 0, 1, 1, 1], [0], [0]>} : vector<2x8x8xbf16>, vector<2x8x8xbf16>, vector<2x8x8xf32> -> vector<2x8x8xf32>
    "tpu.trace_stop"() : () -> ()
    %cst_14 = arith.constant dense<0xFF800000> : vector<2x8xf32>
    %44 = vector.multi_reduction <maximumf>, %43, %cst_14 [2] : vector<2x8x8xf32> to vector<2x8xf32>
    %45 = vector.shape_cast %44 : vector<2x8xf32> to vector<2x8x1xf32>
    %46 = vector.broadcast %45 : vector<2x8x1xf32> to vector<2x8x8xf32>
    %47 = arith.subf %43, %46 : vector<2x8x8xf32>
    %48 = math.exp %47 : vector<2x8x8xf32>
    %cst_15 = arith.constant dense<0.000000e+00> : vector<2x8xf32>
    %49 = vector.multi_reduction <add>, %48, %cst_15 [2] : vector<2x8x8xf32> to vector<2x8xf32>
    %50 = vector.shape_cast %49 : vector<2x8xf32> to vector<2x8x1xf32>
    %51 = vector.broadcast %50 : vector<2x8x1xf32> to vector<2x8x8xf32>
    %52 = arith.divf %48, %51 : vector<2x8x8xf32>
    %53 = arith.truncf %52 : vector<2x8x8xf32> to vector<2x8x8xbf16>
    %54 = arith.truncf %40 : vector<2x8x8xf32> to vector<2x8x8xbf16>
    "tpu.trace_start"() <{level = 10 : i32, message = "bqk,bkd->bqd"}> : () -> ()
    %cst_16 = arith.constant dense<0.000000e+00> : vector<2x8x8xf32>
    %55 = tpu.matmul %53, %54, %cst_16 {dimension_numbers = #tpu.dot_dimension_numbers<[2], [1], [1], [2], [0, 0, 0, 1, 1, 2], [0], [0]>} : vector<2x8x8xbf16>, vector<2x8x8xbf16>, vector<2x8x8xf32> -> vector<2x8x8xf32>
    "tpu.trace_stop"() : () -> ()
    %56 = vector.shape_cast %55 : vector<2x8x8xf32> to vector<16x8xf32>
    %57 = vector.extract_strided_slice %8 {offsets = [0, 16], sizes = [16, 8], strides = [1, 1]} : vector<16x96xf32> to vector<16x8xf32>
    %cst_17 = arith.constant 0.353553385 : f32
    %58 = vector.broadcast %cst_17 : f32 to vector<16x8xf32>
    %59 = arith.mulf %57, %58 : vector<16x8xf32>
    %60 = vector.extract_strided_slice %8 {offsets = [0, 48], sizes = [16, 8], strides = [1, 1]} : vector<16x96xf32> to vector<16x8xf32>
    %61 = vector.extract_strided_slice %8 {offsets = [0, 80], sizes = [16, 8], strides = [1, 1]} : vector<16x96xf32> to vector<16x8xf32>
    %62 = vector.shape_cast %59 : vector<16x8xf32> to vector<2x8x8xf32>
    %63 = vector.shape_cast %60 : vector<16x8xf32> to vector<2x8x8xf32>
    %64 = vector.shape_cast %61 : vector<16x8xf32> to vector<2x8x8xf32>
    %65 = arith.truncf %62 : vector<2x8x8xf32> to vector<2x8x8xbf16>
    %66 = arith.truncf %63 : vector<2x8x8xf32> to vector<2x8x8xbf16>
    "tpu.trace_start"() <{level = 10 : i32, message = "bqd,bkd->bqk"}> : () -> ()
    %cst_18 = arith.constant dense<0.000000e+00> : vector<2x8x8xf32>
    %67 = tpu.matmul %65, %66, %cst_18 {dimension_numbers = #tpu.dot_dimension_numbers<[2], [2], [1], [1], [0, 0, 0, 1, 1, 1], [0], [0]>} : vector<2x8x8xbf16>, vector<2x8x8xbf16>, vector<2x8x8xf32> -> vector<2x8x8xf32>
    "tpu.trace_stop"() : () -> ()
    %cst_19 = arith.constant dense<0xFF800000> : vector<2x8xf32>
    %68 = vector.multi_reduction <maximumf>, %67, %cst_19 [2] : vector<2x8x8xf32> to vector<2x8xf32>
    %69 = vector.shape_cast %68 : vector<2x8xf32> to vector<2x8x1xf32>
    %70 = vector.broadcast %69 : vector<2x8x1xf32> to vector<2x8x8xf32>
    %71 = arith.subf %67, %70 : vector<2x8x8xf32>
    %72 = math.exp %71 : vector<2x8x8xf32>
    %cst_20 = arith.constant dense<0.000000e+00> : vector<2x8xf32>
    %73 = vector.multi_reduction <add>, %72, %cst_20 [2] : vector<2x8x8xf32> to vector<2x8xf32>
    %74 = vector.shape_cast %73 : vector<2x8xf32> to vector<2x8x1xf32>
    %75 = vector.broadcast %74 : vector<2x8x1xf32> to vector<2x8x8xf32>
    %76 = arith.divf %72, %75 : vector<2x8x8xf32>
    %77 = arith.truncf %76 : vector<2x8x8xf32> to vector<2x8x8xbf16>
    %78 = arith.truncf %64 : vector<2x8x8xf32> to vector<2x8x8xbf16>
    "tpu.trace_start"() <{level = 10 : i32, message = "bqk,bkd->bqd"}> : () -> ()
    %cst_21 = arith.constant dense<0.000000e+00> : vector<2x8x8xf32>
    %79 = tpu.matmul %77, %78, %cst_21 {dimension_numbers = #tpu.dot_dimension_numbers<[2], [1], [1], [2], [0, 0, 0, 1, 1, 2], [0], [0]>} : vector<2x8x8xbf16>, vector<2x8x8xbf16>, vector<2x8x8xf32> -> vector<2x8x8xf32>
    "tpu.trace_stop"() : () -> ()
    %80 = vector.shape_cast %79 : vector<2x8x8xf32> to vector<16x8xf32>
    %81 = vector.extract_strided_slice %8 {offsets = [0, 24], sizes = [16, 8], strides = [1, 1]} : vector<16x96xf32> to vector<16x8xf32>
    %cst_22 = arith.constant 0.353553385 : f32
    %82 = vector.broadcast %cst_22 : f32 to vector<16x8xf32>
    %83 = arith.mulf %81, %82 : vector<16x8xf32>
    %84 = vector.extract_strided_slice %8 {offsets = [0, 56], sizes = [16, 8], strides = [1, 1]} : vector<16x96xf32> to vector<16x8xf32>
    %85 = vector.extract_strided_slice %8 {offsets = [0, 88], sizes = [16, 8], strides = [1, 1]} : vector<16x96xf32> to vector<16x8xf32>
    %86 = vector.shape_cast %83 : vector<16x8xf32> to vector<2x8x8xf32>
    %87 = vector.shape_cast %84 : vector<16x8xf32> to vector<2x8x8xf32>
    %88 = vector.shape_cast %85 : vector<16x8xf32> to vector<2x8x8xf32>
    %89 = arith.truncf %86 : vector<2x8x8xf32> to vector<2x8x8xbf16>
    %90 = arith.truncf %87 : vector<2x8x8xf32> to vector<2x8x8xbf16>
    "tpu.trace_start"() <{level = 10 : i32, message = "bqd,bkd->bqk"}> : () -> ()
    %cst_23 = arith.constant dense<0.000000e+00> : vector<2x8x8xf32>
    %91 = tpu.matmul %89, %90, %cst_23 {dimension_numbers = #tpu.dot_dimension_numbers<[2], [2], [1], [1], [0, 0, 0, 1, 1, 1], [0], [0]>} : vector<2x8x8xbf16>, vector<2x8x8xbf16>, vector<2x8x8xf32> -> vector<2x8x8xf32>
    "tpu.trace_stop"() : () -> ()
    %cst_24 = arith.constant dense<0xFF800000> : vector<2x8xf32>
    %92 = vector.multi_reduction <maximumf>, %91, %cst_24 [2] : vector<2x8x8xf32> to vector<2x8xf32>
    %93 = vector.shape_cast %92 : vector<2x8xf32> to vector<2x8x1xf32>
    %94 = vector.broadcast %93 : vector<2x8x1xf32> to vector<2x8x8xf32>
    %95 = arith.subf %91, %94 : vector<2x8x8xf32>
    %96 = math.exp %95 : vector<2x8x8xf32>
    %cst_25 = arith.constant dense<0.000000e+00> : vector<2x8xf32>
    %97 = vector.multi_reduction <add>, %96, %cst_25 [2] : vector<2x8x8xf32> to vector<2x8xf32>
    %98 = vector.shape_cast %97 : vector<2x8xf32> to vector<2x8x1xf32>
    %99 = vector.broadcast %98 : vector<2x8x1xf32> to vector<2x8x8xf32>
    %100 = arith.divf %96, %99 : vector<2x8x8xf32>
    %101 = arith.truncf %100 : vector<2x8x8xf32> to vector<2x8x8xbf16>
    %102 = arith.truncf %88 : vector<2x8x8xf32> to vector<2x8x8xbf16>
    "tpu.trace_start"() <{level = 10 : i32, message = "bqk,bkd->bqd"}> : () -> ()
    %cst_26 = arith.constant dense<0.000000e+00> : vector<2x8x8xf32>
    %103 = tpu.matmul %101, %102, %cst_26 {dimension_numbers = #tpu.dot_dimension_numbers<[2], [1], [1], [2], [0, 0, 0, 1, 1, 2], [0], [0]>} : vector<2x8x8xbf16>, vector<2x8x8xbf16>, vector<2x8x8xf32> -> vector<2x8x8xf32>
    "tpu.trace_stop"() : () -> ()
    %104 = vector.shape_cast %103 : vector<2x8x8xf32> to vector<16x8xf32>
    %105 = tpu.concatenate %32, %56, %80, %104 in 1 : vector<16x8xf32>, vector<16x8xf32>, vector<16x8xf32>, vector<16x8xf32> -> vector<16x32xf32>
    %106 = arith.truncf %105 : vector<16x32xf32> to vector<16x32xbf16>
    %c0_27 = arith.constant 0 : index
    %c0_28 = arith.constant 0 : index
    %c0_29 = arith.constant 0 : index
    %107 = vector.load %arg4[%c0_27, %c0_28, %c0_29] : memref<1x32x32xbf16, #tpu.memory_space<vmem>>, vector<1x32x32xbf16>
    %108 = vector.shape_cast %107 : vector<1x32x32xbf16> to vector<32x32xbf16>
    %cst_30 = arith.constant dense<0.000000e+00> : vector<16x32xf32>
    %109 = tpu.matmul %106, %108, %cst_30 {dimension_numbers = #tpu.dot_dimension_numbers<[1], [0], [0], [1], [0, 0, 1, 1], [], []>} : vector<16x32xbf16>, vector<32x32xbf16>, vector<16x32xf32> -> vector<16x32xf32>
    %c0_31 = arith.constant 0 : index
    %c0_32 = arith.constant 0 : index
    %c0_33 = arith.constant 0 : index
    %110 = vector.load %arg5[%c0_31, %c0_32, %c0_33] : memref<1x1x32xf32, #tpu.memory_space<vmem>>, vector<1x1x32xf32>
    %111 = vector.shape_cast %110 : vector<1x1x32xf32> to vector<1x32xf32>
    %112 = vector.broadcast %111 : vector<1x32xf32> to vector<16x32xf32>
    %113 = arith.addf %109, %112 : vector<16x32xf32>
    %114 = arith.addf %0, %113 : vector<16x32xf32>
    %c0_34 = arith.constant 0 : index
    %c0_35 = arith.constant 0 : index
    %c0_36 = arith.constant 0 : index
    %115 = vector.load %arg6[%c0_34, %c0_35, %c0_36] : memref<1x1x32xf32, #tpu.memory_space<vmem>>, vector<1x1x32xf32>
    %116 = vector.shape_cast %115 : vector<1x1x32xf32> to vector<1x32xf32>
    %c0_37 = arith.constant 0 : index
    %c0_38 = arith.constant 0 : index
    %c0_39 = arith.constant 0 : index
    %117 = vector.load %arg7[%c0_37, %c0_38, %c0_39] : memref<1x1x32xf32, #tpu.memory_space<vmem>>, vector<1x1x32xf32>
    %118 = vector.shape_cast %117 : vector<1x1x32xf32> to vector<1x32xf32>
    %cst_40 = arith.constant dense<0.000000e+00> : vector<16xf32>
    %119 = vector.multi_reduction <add>, %114, %cst_40 [1] : vector<16x32xf32> to vector<16xf32>
    %120 = vector.shape_cast %119 : vector<16xf32> to vector<16x1xf32>
    %cst_41 = arith.constant 3.200000e+01 : f32
    %121 = vector.broadcast %cst_41 : f32 to vector<16x1xf32>
    %122 = arith.divf %120, %121 : vector<16x1xf32>
    %123 = vector.broadcast %122 : vector<16x1xf32> to vector<16x32xf32>
    %124 = arith.subf %114, %123 : vector<16x32xf32>
    %125 = arith.mulf %124, %124 : vector<16x32xf32>
    %cst_42 = arith.constant dense<0.000000e+00> : vector<16xf32>
    %126 = vector.multi_reduction <add>, %125, %cst_42 [1] : vector<16x32xf32> to vector<16xf32>
    %127 = vector.shape_cast %126 : vector<16xf32> to vector<16x1xf32>
    %cst_43 = arith.constant 3.200000e+01 : f32
    %128 = vector.broadcast %cst_43 : f32 to vector<16x1xf32>
    %129 = arith.divf %127, %128 : vector<16x1xf32>
    %cst_44 = arith.constant 9.99999974E-6 : f32
    %130 = vector.broadcast %cst_44 : f32 to vector<16x1xf32>
    %131 = arith.addf %129, %130 : vector<16x1xf32>
    %132 = math.rsqrt %131 : vector<16x1xf32>
    %133 = vector.broadcast %132 : vector<16x1xf32> to vector<16x32xf32>
    %134 = arith.mulf %124, %133 : vector<16x32xf32>
    %135 = vector.broadcast %116 : vector<1x32xf32> to vector<16x32xf32>
    %136 = arith.mulf %134, %135 : vector<16x32xf32>
    %137 = vector.broadcast %118 : vector<1x32xf32> to vector<16x32xf32>
    %138 = arith.addf %136, %137 : vector<16x32xf32>
    %139 = arith.truncf %138 : vector<16x32xf32> to vector<16x32xbf16>
    %c0_45 = arith.constant 0 : index
    %c0_46 = arith.constant 0 : index
    %c0_47 = arith.constant 0 : index
    %140 = vector.load %arg8[%c0_45, %c0_46, %c0_47] : memref<1x32x32xbf16, #tpu.memory_space<vmem>>, vector<1x32x32xbf16>
    %141 = vector.shape_cast %140 : vector<1x32x32xbf16> to vector<32x32xbf16>
    %cst_48 = arith.constant dense<0.000000e+00> : vector<16x32xf32>
    %142 = tpu.matmul %139, %141, %cst_48 {dimension_numbers = #tpu.dot_dimension_numbers<[1], [0], [0], [1], [0, 0, 1, 1], [], []>} : vector<16x32xbf16>, vector<32x32xbf16>, vector<16x32xf32> -> vector<16x32xf32>
    %c0_49 = arith.constant 0 : index
    %c0_50 = arith.constant 0 : index
    %c0_51 = arith.constant 0 : index
    %143 = vector.load %arg9[%c0_49, %c0_50, %c0_51] : memref<1x1x32xf32, #tpu.memory_space<vmem>>, vector<1x1x32xf32>
    %144 = vector.shape_cast %143 : vector<1x1x32xf32> to vector<1x32xf32>
    %145 = vector.broadcast %144 : vector<1x32xf32> to vector<16x32xf32>
    %146 = arith.addf %142, %145 : vector<16x32xf32>
    %cst_52 = arith.constant 0.000000e+00 : f32
    %147 = vector.broadcast %cst_52 : f32 to vector<16x32xf32>
    %148 = arith.maximumf %146, %147 : vector<16x32xf32>
    %149 = arith.truncf %148 : vector<16x32xf32> to vector<16x32xbf16>
    %c0_53 = arith.constant 0 : index
    %c0_54 = arith.constant 0 : index
    %c0_55 = arith.constant 0 : index
    %150 = vector.load %arg10[%c0_53, %c0_54, %c0_55] : memref<1x32x32xbf16, #tpu.memory_space<vmem>>, vector<1x32x32xbf16>
    %151 = vector.shape_cast %150 : vector<1x32x32xbf16> to vector<32x32xbf16>
    %cst_56 = arith.constant dense<0.000000e+00> : vector<16x32xf32>
    %152 = tpu.matmul %149, %151, %cst_56 {dimension_numbers = #tpu.dot_dimension_numbers<[1], [0], [0], [1], [0, 0, 1, 1], [], []>} : vector<16x32xbf16>, vector<32x32xbf16>, vector<16x32xf32> -> vector<16x32xf32>
    %c0_57 = arith.constant 0 : index
    %c0_58 = arith.constant 0 : index
    %c0_59 = arith.constant 0 : index
    %153 = vector.load %arg11[%c0_57, %c0_58, %c0_59] : memref<1x1x32xf32, #tpu.memory_space<vmem>>, vector<1x1x32xf32>
    %154 = vector.shape_cast %153 : vector<1x1x32xf32> to vector<1x32xf32>
    %155 = vector.broadcast %154 : vector<1x32xf32> to vector<16x32xf32>
    %156 = arith.addf %152, %155 : vector<16x32xf32>
    %157 = arith.addf %138, %156 : vector<16x32xf32>
    %c0_60 = arith.constant 0 : index
    %c0_61 = arith.constant 0 : index
    %c0_62 = arith.constant 0 : index
    %158 = vector.load %arg12[%c0_60, %c0_61, %c0_62] : memref<1x1x32xf32, #tpu.memory_space<vmem>>, vector<1x1x32xf32>
    %159 = vector.shape_cast %158 : vector<1x1x32xf32> to vector<1x32xf32>
    %c0_63 = arith.constant 0 : index
    %c0_64 = arith.constant 0 : index
    %c0_65 = arith.constant 0 : index
    %160 = vector.load %arg13[%c0_63, %c0_64, %c0_65] : memref<1x1x32xf32, #tpu.memory_space<vmem>>, vector<1x1x32xf32>
    %161 = vector.shape_cast %160 : vector<1x1x32xf32> to vector<1x32xf32>
    %cst_66 = arith.constant dense<0.000000e+00> : vector<16xf32>
    %162 = vector.multi_reduction <add>, %157, %cst_66 [1] : vector<16x32xf32> to vector<16xf32>
    %163 = vector.shape_cast %162 : vector<16xf32> to vector<16x1xf32>
    %cst_67 = arith.constant 3.200000e+01 : f32
    %164 = vector.broadcast %cst_67 : f32 to vector<16x1xf32>
    %165 = arith.divf %163, %164 : vector<16x1xf32>
    %166 = vector.broadcast %165 : vector<16x1xf32> to vector<16x32xf32>
    %167 = arith.subf %157, %166 : vector<16x32xf32>
    %168 = arith.mulf %167, %167 : vector<16x32xf32>
    %cst_68 = arith.constant dense<0.000000e+00> : vector<16xf32>
    %169 = vector.multi_reduction <add>, %168, %cst_68 [1] : vector<16x32xf32> to vector<16xf32>
    %170 = vector.shape_cast %169 : vector<16xf32> to vector<16x1xf32>
    %cst_69 = arith.constant 3.200000e+01 : f32
    %171 = vector.broadcast %cst_69 : f32 to vector<16x1xf32>
    %172 = arith.divf %170, %171 : vector<16x1xf32>
    %cst_70 = arith.constant 9.99999974E-6 : f32
    %173 = vector.broadcast %cst_70 : f32 to vector<16x1xf32>
    %174 = arith.addf %172, %173 : vector<16x1xf32>
    %175 = math.rsqrt %174 : vector<16x1xf32>
    %176 = vector.broadcast %175 : vector<16x1xf32> to vector<16x32xf32>
    %177 = arith.mulf %167, %176 : vector<16x32xf32>
    %178 = vector.broadcast %159 : vector<1x32xf32> to vector<16x32xf32>
    %179 = arith.mulf %177, %178 : vector<16x32xf32>
    %180 = vector.broadcast %161 : vector<1x32xf32> to vector<16x32xf32>
    %181 = arith.addf %179, %180 : vector<16x32xf32>
    %c0_71 = arith.constant 0 : index
    %c0_72 = arith.constant 0 : index
    %182 = vector.load %arg14[%c0_71, %c0_72] : memref<1x32xf32, #tpu.memory_space<vmem>>, vector<1x32xf32>
    %c0_73 = arith.constant 0 : index
    %c0_74 = arith.constant 0 : index
    %183 = vector.load %arg15[%c0_73, %c0_74] : memref<1x32xf32, #tpu.memory_space<vmem>>, vector<1x32xf32>
    %cst_75 = arith.constant dense<0.000000e+00> : vector<16xf32>
    %184 = vector.multi_reduction <add>, %181, %cst_75 [1] : vector<16x32xf32> to vector<16xf32>
    %185 = vector.shape_cast %184 : vector<16xf32> to vector<16x1xf32>
    %cst_76 = arith.constant 3.200000e+01 : f32
    %186 = vector.broadcast %cst_76 : f32 to vector<16x1xf32>
    %187 = arith.divf %185, %186 : vector<16x1xf32>
    %188 = vector.broadcast %187 : vector<16x1xf32> to vector<16x32xf32>
    %189 = arith.subf %181, %188 : vector<16x32xf32>
    %190 = arith.mulf %189, %189 : vector<16x32xf32>
    %cst_77 = arith.constant dense<0.000000e+00> : vector<16xf32>
    %191 = vector.multi_reduction <add>, %190, %cst_77 [1] : vector<16x32xf32> to vector<16xf32>
    %192 = vector.shape_cast %191 : vector<16xf32> to vector<16x1xf32>
    %cst_78 = arith.constant 3.200000e+01 : f32
    %193 = vector.broadcast %cst_78 : f32 to vector<16x1xf32>
    %194 = arith.divf %192, %193 : vector<16x1xf32>
    %cst_79 = arith.constant 9.99999974E-6 : f32
    %195 = vector.broadcast %cst_79 : f32 to vector<16x1xf32>
    %196 = arith.addf %194, %195 : vector<16x1xf32>
    %197 = math.rsqrt %196 : vector<16x1xf32>
    %198 = vector.broadcast %197 : vector<16x1xf32> to vector<16x32xf32>
    %199 = arith.mulf %189, %198 : vector<16x32xf32>
    %200 = vector.broadcast %182 : vector<1x32xf32> to vector<16x32xf32>
    %201 = arith.mulf %199, %200 : vector<16x32xf32>
    %202 = vector.broadcast %183 : vector<1x32xf32> to vector<16x32xf32>
    %203 = arith.addf %201, %202 : vector<16x32xf32>
    %c0_80 = arith.constant 0 : index
    %c0_81 = arith.constant 0 : index
    %204 = vector.load %arg16[%c0_80, %c0_81] : memref<16x32xf32, #tpu.memory_space<vmem>>, vector<16x32xf32>
    tpu.vector_store %arg16[%c0_80, %c0_81], %203 {strides = array<i32>} : memref<16x32xf32, #tpu.memory_space<vmem>>, vector<16x32xf32>,
    return
  }
  func.func @transform_0(%arg0: i32) -> (i32, i32) {
    %c0_i32 = arith.constant 0 : i32
    %c0_i32_0 = arith.constant 0 : i32
    %c0_i32_1 = arith.constant 0 : i32
    return %c0_i32, %c0_i32_0 : i32, i32
  }
  func.func @transform_1(%arg0: i32) -> (i32, i32, i32) {
    %c0_i32 = arith.constant 0 : i32
    %c0_i32_0 = arith.constant 0 : i32
    %c0_i32_1 = arith.constant 0 : i32
    %c0_i32_2 = arith.constant 0 : i32
    return %c0_i32, %c0_i32_0, %c0_i32_1 : i32, i32, i32
  }
  func.func @transform_2(%arg0: i32) -> (i32, i32, i32) {
    %c0_i32 = arith.constant 0 : i32
    %c0_i32_0 = arith.constant 0 : i32
    %c0_i32_1 = arith.constant 0 : i32
    %c0_i32_2 = arith.constant 0 : i32
    return %c0_i32, %c0_i32_0, %c0_i32_1 : i32, i32, i32
  }
  func.func @transform_3(%arg0: i32) -> (i32, i32, i32) {
    %c0_i32 = arith.constant 0 : i32
    %c0_i32_0 = arith.constant 0 : i32
    %c0_i32_1 = arith.constant 0 : i32
    %c0_i32_2 = arith.constant 0 : i32
    return %c0_i32, %c0_i32_0, %c0_i32_1 : i32, i32, i32
  }
  func.func @transform_4(%arg0: i32) -> (i32, i32, i32) {
    %c0_i32 = arith.constant 0 : i32
    %c0_i32_0 = arith.constant 0 : i32
    %c0_i32_1 = arith.constant 0 : i32
    %c0_i32_2 = arith.constant 0 : i32
    return %c0_i32, %c0_i32_0, %c0_i32_1 : i32, i32, i32
  }
  func.func @transform_5(%arg0: i32) -> (i32, i32, i32) {
    %c0_i32 = arith.constant 0 : i32
    %c0_i32_0 = arith.constant 0 : i32
    %c0_i32_1 = arith.constant 0 : i32
    %c0_i32_2 = arith.constant 0 : i32
    return %c0_i32, %c0_i32_0, %c0_i32_1 : i32, i32, i32
  }
  func.func @transform_6(%arg0: i32) -> (i32, i32, i32) {
    %c0_i32 = arith.constant 0 : i32
    %c0_i32_0 = arith.constant 0 : i32
    %c0_i32_1 = arith.constant 0 : i32
    %c0_i32_2 = arith.constant 0 : i32
    return %c0_i32, %c0_i32_0, %c0_i32_1 : i32, i32, i32
  }
  func.func @transform_7(%arg0: i32) -> (i32, i32, i32) {
    %c0_i32 = arith.constant 0 : i32
    %c0_i32_0 = arith.constant 0 : i32
    %c0_i32_1 = arith.constant 0 : i32
    %c0_i32_2 = arith.constant 0 : i32
    return %c0_i32, %c0_i32_0, %c0_i32_1 : i32, i32, i32
  }
  func.func @transform_8(%arg0: i32) -> (i32, i32, i32) {
    %c0_i32 = arith.constant 0 : i32
    %c0_i32_0 = arith.constant 0 : i32
    %c0_i32_1 = arith.constant 0 : i32
    %c0_i32_2 = arith.constant 0 : i32
    return %c0_i32, %c0_i32_0, %c0_i32_1 : i32, i32, i32
  }
  func.func @transform_9(%arg0: i32) -> (i32, i32, i32) {
    %c0_i32 = arith.constant 0 : i32
    %c0_i32_0 = arith.constant 0 : i32
    %c0_i32_1 = arith.constant 0 : i32
    %c0_i32_2 = arith.constant 0 : i32
    return %c0_i32, %c0_i32_0, %c0_i32_1 : i32, i32, i32
  }
  func.func @transform_10(%arg0: i32) -> (i32, i32, i32) {
    %c0_i32 = arith.constant 0 : i32
    %c0_i32_0 = arith.constant 0 : i32
    %c0_i32_1 = arith.constant 0 : i32
    %c0_i32_2 = arith.constant 0 : i32
    return %c0_i32, %c0_i32_0, %c0_i32_1 : i32, i32, i32
  }
  func.func @transform_11(%arg0: i32) -> (i32, i32, i32) {
    %c0_i32 = arith.constant 0 : i32
    %c0_i32_0 = arith.constant 0 : i32
    %c0_i32_1 = arith.constant 0 : i32
    %c0_i32_2 = arith.constant 0 : i32
    return %c0_i32, %c0_i32_0, %c0_i32_1 : i32, i32, i32
  }
  func.func @transform_12(%arg0: i32) -> (i32, i32, i32) {
    %c0_i32 = arith.constant 0 : i32
    %c0_i32_0 = arith.constant 0 : i32
    %c0_i32_1 = arith.constant 0 : i32
    %c0_i32_2 = arith.constant 0 : i32
    return %c0_i32, %c0_i32_0, %c0_i32_1 : i32, i32, i32
  }
  func.func @transform_13(%arg0: i32) -> (i32, i32) {
    %c0_i32 = arith.constant 0 : i32
    %c0_i32_0 = arith.constant 0 : i32
    %c0_i32_1 = arith.constant 0 : i32
    return %c0_i32, %c0_i32_0 : i32, i32
  }
  func.func @transform_14(%arg0: i32) -> (i32, i32) {
    %c0_i32 = arith.constant 0 : i32
    %c0_i32_0 = arith.constant 0 : i32
    %c0_i32_1 = arith.constant 0 : i32
    return %c0_i32, %c0_i32_0 : i32, i32
  }
  func.func @transform_15(%arg0: i32) -> (i32, i32) {
    %c0_i32 = arith.constant 0 : i32
    %c0_i32_0 = arith.constant 0 : i32
    %c0_i32_1 = arith.constant 0 : i32
    return %c0_i32, %c0_i32_0 : i32, i32
  }
}

</mosaic_0001>

<bundles_post_ra>
// kernel: tpu_custom_call.1
= control target key start
LH: loop header
LB: loop body
LE: loop exit
PB: predicated region body
PF: predicated region fallthrough
CT: control target
= control target key end

     0   :  { %s2374_s0 = inlined_call_operand.hbm [shape: f32[16,32], index: 0, kind: input, shape index: {}]   ;;  %s2375_s1 = inlined_call_operand.hbm [shape: bf16[1,32,96], index: 1, kind: input, shape index: {}]   ;;  %s2376_s2 = inlined_call_operand.vmem [shape: f32[1,1,96], index: 2, kind: input, shape index: {}]   ;;  %s2377_s3 = inlined_call_operand.hbm [shape: bf16[1,32,32], index: 3, kind: input, shape index: {}]   ;;  %s2378_s4 = inlined_call_operand.vmem [shape: f32[1,1,32], index: 4, kind: input, shape index: {}]   ;;  %s2379_s5 = inlined_call_operand.hbm [shape: f32[1,1,32], index: 5, kind: input, shape index: {}]   ;;  %s2380_s6 = inlined_call_operand.hbm [shape: f32[1,1,32], index: 6, kind: input, shape index: {}]   ;;  %s2381_s7 = inlined_call_operand.vmem [shape: bf16[1,32,32], index: 7, kind: input, shape index: {}]   ;;  %s2382_s8 = inlined_call_operand.hbm [shape: f32[1,1,32], index: 8, kind: input, shape index: {}]   ;;  %s2383_s9 = inlined_call_operand.vmem [shape: bf16[1,32,32], index: 9, kind: input, shape index: {}]   ;;  %s2384_s10 = inlined_call_operand.vmem [shape: f32[1,1,32], index: 10, kind: input, shape index: {}]   ;;  %s2385_s11 = inlined_call_operand.vmem [shape: f32[1,1,32], index: 11, kind: input, shape index: {}]   ;;  %s2386_s12 = inlined_call_operand.vmem [shape: f32[1,1,32], index: 12, kind: input, shape index: {}]   ;;  %s2387_s13 = inlined_call_operand.vmem [shape: f32[1,32], index: 13, kind: input, shape index: {}]   ;;  %s2388_s14 = inlined_call_operand.vmem [shape: f32[1,32], index: 14, kind: input, shape index: {}]   ;;  %s2389_s15 = inlined_call_operand.hbm [shape: f32[16,32], index: 15, kind: output, shape index: {}]  }
   0x1   :  { %2391 = sst [smem:[#allocation19_spill]] %s2389_s15 }
   0x2   :  { %20 = vsyncpa [#allocation3], 0 }
   0x3   :  { %21 = vsyncpa [#allocation6], 0 }
   0x4   :  { %22 = vsyncpa [#allocation9], 0 }
   0x5   :  { %23 = vsyncpa [#allocation12], 0 }
   0x6   :  { %24 = vsyncpa [#allocation4], 0  ;;  %s1950_s18 = smov [#allocation5]   ;;  %s1786_s22 = scalar_lea.hbm %s2375_s1, 256 }
   0x7   :  { %s42_s19 = sshll.u32 %s1950_s18, 4  ;;  %p1787_p0 = scmp.ne.s32.totalorder %s2375_s1, %s1786_s22  ;;  %s43_s19 = int_to_ptr.vmem [resolvable:$true] %s42_s19 }
   0x8   :  { %p1790_p1 = scmp.lt.u32.totalorder %s1786_s22, %s2375_s1 }
   0xa   :  { %p1792_p2 = pnand %p1790_p1, %p1787_p0 }
   0xc   :  { %1795 = shalt.err (!%p1792_p2)
}
   0xd   :  { %s1796_s27 = scalar_lea.vmem %s43_s19, 256  ;;  %p1801_p4 = scmp.lt.s32.totalorder %s43_s19, %s43_s19 }
   0xe   :  { %p1797_p3 = scmp.ne.s32.totalorder %s43_s19, %s1796_s27  ;;  %p1802_p5 = scmp.lt.s32.totalorder %s1796_s27, %s1796_s27 }
  0x10   :  { %p1803_p6 = por %p1802_p5, %p1801_p4 }
  0x12   :  { %p1804_p7 = pnand %p1803_p6, %p1797_p3 }
  0x14   :  { %1807 = shalt.err (!%p1804_p7)
}
  0x15   :  { %s1951_s28 = smov 64   ;;  %s1952_s29 = smov 4  }
  0x16   :  { %48 = dma.hbm_to_vmem [thread:$0]  %s2375_s1, 256, %s43_s19, [#allocation6], %s1951_s28, %s1951_s28, %s1952_s29  }
  0x17   :  { %s1953_s17 = smov [#allocation8]   ;;  %s1954_s20 = smov [#allocation2]  }
  0x18   :  { %s71_s18 = sshll.u32 %s1953_s17, 4  ;;  %s30_s21 = sshll.u32 %s1954_s20, 4  ;;  %s72_s18 = int_to_ptr.vmem [resolvable:$true] %s71_s18  ;;  %s31_s21 = int_to_ptr.vmem [resolvable:$true] %s30_s21 }
  0x19   :  { %s1808_s24 = scalar_lea.hbm %s2379_s5, 16 }
  0x1a   :  { %p1809_p8 = scmp.ne.s32.totalorder %s2379_s5, %s1808_s24  ;;  %p1812_p9 = scmp.lt.u32.totalorder %s1808_s24, %s2379_s5 }
  0x1c   :  { %p1814_p10 = pnand %p1812_p9, %p1809_p8 }
  0x1e   :  { %1817 = shalt.err (!%p1814_p10)
}
  0x1f   :  { %s1818_s1 = scalar_lea.vmem %s72_s18, 16  ;;  %s1822_s19 = scalar_lea.vmem %s72_s18, 32 }
  0x20   :  { %p1819_p11 = scmp.ne.s32.totalorder %s72_s18, %s1818_s1  ;;  %p1823_p12 = scmp.lt.s32.totalorder %s72_s18, %s72_s18 }
  0x21   :  { %p1824_p13 = scmp.lt.s32.totalorder %s1822_s19, %s1818_s1 }
  0x23   :  { %p1825_p0 = por %p1824_p13, %p1823_p12 }
  0x25   :  { %p1826_p1 = pnand %p1825_p0, %p1819_p11 }
  0x27   :  { %1829 = shalt.err (!%p1826_p1)
}
  0x28   :  { %74 = dma.hbm_to_vmem [thread:$0]  %s2379_s5, 16, %s72_s18, [#allocation9]  }
  0x29   :  { %s1830_s15 = scalar_lea.hbm %s2374_s0, 256 }
  0x2a   :  { %p1831_p2 = scmp.ne.s32.totalorder %s2374_s0, %s1830_s15  ;;  %p1834_p3 = scmp.lt.u32.totalorder %s1830_s15, %s2374_s0 }
  0x2c   :  { %p1836_p4 = pnand %p1834_p3, %p1831_p2 }
  0x2e   :  { %1839 = shalt.err (!%p1836_p4)
}
  0x2f   :  { %s1840_s26 = scalar_lea.vmem %s31_s21, 256  ;;  %p1845_p6 = scmp.lt.s32.totalorder %s31_s21, %s31_s21 }
  0x30   :  { %p1841_p5 = scmp.ne.s32.totalorder %s31_s21, %s1840_s26  ;;  %p1846_p7 = scmp.lt.s32.totalorder %s1840_s26, %s1840_s26 }
  0x32   :  { %p1847_p8 = por %p1846_p7, %p1845_p6 }
  0x34   :  { %p1848_p9 = pnand %p1847_p8, %p1841_p5 }
  0x36   :  { %1851 = shalt.err (!%p1848_p9)
}
  0x37   :  { %s1955_s5 = smov 128   ;;  %s1956_s18 = smov 8  }
  0x38   :  { %36 = dma.hbm_to_vmem [thread:$0]  %s2374_s0, 256, %s31_s21, [#allocation3], %s1955_s5, %s1955_s5, %s1956_s18  }
  0x39   :  { %s1957_s19 = smov [#allocation7]   ;;  %s1958_s16 = smov [#allocation10]  }
  0x3a   :  { %s56_s30 = sshll.u32 %s1957_s19, 4  ;;  %s81_s17 = sshll.u32 %s1958_s16, 4  ;;  %s57_s30 = int_to_ptr.vmem [resolvable:$true] %s56_s30  ;;  %s82_s17 = int_to_ptr.vmem [resolvable:$true] %s81_s17 }
  0x3b   :  { %s1852_s22 = scalar_lea.hbm %s2377_s3, 256 }
  0x3c   :  { %p1853_p10 = scmp.ne.s32.totalorder %s2377_s3, %s1852_s22  ;;  %p1856_p11 = scmp.lt.u32.totalorder %s1852_s22, %s2377_s3 }
  0x3e   :  { %p1858_p12 = pnand %p1856_p11, %p1853_p10 }
  0x40   :  { %1861 = shalt.err (!%p1858_p12)
}
  0x41   :  { %s1862_s0 = scalar_lea.vmem %s57_s30, 256  ;;  %p1867_p0 = scmp.lt.s32.totalorder %s57_s30, %s57_s30 }
  0x42   :  { %p1863_p13 = scmp.ne.s32.totalorder %s57_s30, %s1862_s0  ;;  %p1868_p1 = scmp.lt.s32.totalorder %s1862_s0, %s1862_s0 }
  0x44   :  { %p1869_p2 = por %p1868_p1, %p1867_p0 }
  0x46   :  { %p1870_p3 = pnand %p1869_p2, %p1863_p13 }
  0x48   :  { %1873 = shalt.err (!%p1870_p3)
}
  0x49   :  { %62 = dma.hbm_to_vmem [thread:$0]  %s2377_s3, 256, %s57_s30, [#allocation6], %s1951_s28, %s1951_s28, %s1952_s29  }
  0x4a   :  { %s1874_s16 = scalar_lea.hbm %s2380_s6, 16 }
  0x4b   :  { %p1875_p4 = scmp.ne.s32.totalorder %s2380_s6, %s1874_s16  ;;  %p1878_p5 = scmp.lt.u32.totalorder %s1874_s16, %s2380_s6 }
  0x4d   :  { %p1880_p6 = pnand %p1878_p5, %p1875_p4 }
  0x4f   :  { %1883 = shalt.err (!%p1880_p6)
}
  0x50   :  { %s1884_s24 = scalar_lea.vmem %s82_s17, 16  ;;  %s1888_s25 = scalar_lea.vmem %s82_s17, 32 }
  0x51   :  { %p1885_p7 = scmp.ne.s32.totalorder %s82_s17, %s1884_s24  ;;  %p1889_p8 = scmp.lt.s32.totalorder %s82_s17, %s82_s17 }
  0x52   :  { %p1890_p9 = scmp.lt.s32.totalorder %s1888_s25, %s1884_s24 }
  0x54   :  { %p1891_p10 = por %p1890_p9, %p1889_p8 }
  0x56   :  { %p1892_p11 = pnand %p1891_p10, %p1885_p7 }
  0x58   :  { %1895 = shalt.err (!%p1892_p11)
}
  0x59   :  { %84 = dma.hbm_to_vmem [thread:$0]  %s2380_s6, 16, %s82_s17, [#allocation9]  }
  0x5a   :  { %s1959_s30 = smov [#allocation11]   ;;  %s1896_s27 = scalar_lea.hbm %s2382_s8, 16 }
  0x5b   :  { %s93_s26 = sshll.u32 %s1959_s30, 4  ;;  %p1897_p12 = scmp.ne.s32.totalorder %s2382_s8, %s1896_s27  ;;  %s94_s26 = int_to_ptr.vmem [resolvable:$true] %s93_s26 }
  0x5c   :  { %p1900_p13 = scmp.lt.u32.totalorder %s1896_s27, %s2382_s8 }
  0x5e   :  { %p1902_p0 = pnand %p1900_p13, %p1897_p12 }
  0x60   :  { %1905 = shalt.err (!%p1902_p0)
}
  0x61   :  { %s1906_s15 = scalar_lea.vmem %s94_s26, 16  ;;  %s1910_s6 = scalar_lea.vmem %s94_s26, 32 }
  0x62   :  { %p1907_p1 = scmp.ne.s32.totalorder %s94_s26, %s1906_s15  ;;  %p1911_p2 = scmp.lt.s32.totalorder %s94_s26, %s94_s26 }
  0x63   :  { %p1912_p3 = scmp.lt.s32.totalorder %s1910_s6, %s1906_s15 }
  0x65   :  { %p1913_p4 = por %p1912_p3, %p1911_p2 }
  0x67   :  { %p1914_p5 = pnand %p1913_p4, %p1907_p1 }
  0x69   :  { %1917 = shalt.err (!%p1914_p5)
}
  0x6a   :  { %96 = dma.hbm_to_vmem [thread:$0]  %s2382_s8, 16, %s94_s26, [#allocation12]  }
  0x6b   :  { %1940 = dma.done.wait [#allocation3], 256  }
  0x6c   :  { %1941 = vsyncadd [#allocation3], 4294967040 }
  0x6d   :  { %1942 = dma.done.wait [#allocation6], 512  }
  0x6e   :  { %1943 = vsyncadd [#allocation6], 4294966784 }
  0x6f   :  { %1944 = dma.done.wait [#allocation9], 32  }
  0x70   :  { %1945 = vsyncadd [#allocation9], 4294967264 }
  0x71   :  { %1946 = dma.done.wait [#allocation12], 16  }
  0x72   :  { %1947 = vsyncadd [#allocation12], 4294967280  ;;  %v1960_v0 = vmov 0.0   ;;  %vm1961_vm0 = vmmov 0   ;;  %v1734_v1 = vld [vmem:[#allocation5] sm:$0xff]   ;;  %v1735_v2 = vld [vmem:[#allocation5 + $0x8] sm:$0xff]  }
  0x73   :  { %1566 = vmatprep.subr.bf16.mxu0 %v1960_v0  ;;  %1570 = vmatprep.mubr.msk.bf16.mxu0 %vm1961_vm0, %v1960_v0  ;;  %v2142_v3 = vld [vmem:[#allocation2] sm:$0xff]  ;;  %v2144_v4 = vld [vmem:[#allocation2 + $0x8] sm:$0xff]  ;;  %vm154_vm1 = vcmask 261120   ;;  %s1962_s24 = smov 96   ;;  %vm208_vm2 = vcmask 64512   ;;  %vm333_vm3 = vcmask 1043456  }
  0x74   :  { %1574 = vmatprep.subr.bf16.mxu1 %v1960_v0  ;;  %1576 = vmatprep.mubr.msk.bf16.mxu1 %vm1961_vm0, %v1960_v0  ;;  %v130_v5 = vpack.c.bf16 %v2144_v4, %v2142_v3  ;;  %v1484_v6 = vld [vmem:[%s2376_s2] ss:$0 sm:$0xff]  ;;  %s1963_s2 = smov 88   ;;  %s1965_s25 = smov 56   ;;  %vm1113_vm4 = vcmask 130048   ;;  %vm1116_vm5 = vcmask 195584  }
  0x75   :  { %1567 = vmatpush3.bf16.msra.mxu0 %v1734_v1  ;;  %s1966_s3 = smov 80   ;;  %s1967_s29 = smov 112  }
  0x76   :  { %1568 = vmatprep.subr.bf16.mxu0 %v1960_v0  ;;  %s1968_s30 = smov 48   ;;  %s1969_s26 = smov 72  }
  0x77   :  { %s1970_s0 = smov 104   ;;  %s1971_s21 = smov 40  }
  0x78   :  { %s1972_s27 = smov 16   ;;  %s1973_s1 = smov 24  }
  0x79   :  { %1569 = vmatpush3.bf16.msra.mxu0 %v1735_v2 }
  0x7a   :  { %1580 = vmatprep.subr.bf16.mxu0 %v1960_v0 }
  0x7c   :  { %1571 = vmatmul.mubr.msk.bf16.vlgmr.msra.gmra.mrb[0].mxu0 %vm154_vm1, %v130_v5 }
  0x7d   :  { %1582 = vmatprep.mubr.msk.bf16.mxu0 %vm1961_vm0, %v1960_v0 }
 0x14f   :  { %v192_v7 = vpop.f32.mrb[0].mxu0 }
 0x150   :  { %v193_v8 = vadd.f32 %v1484_v6, %v192_v7  ;;  %v1572_v9 = vpop.f32.mrb[1].mxu0 }
 0x151   :  { %v195_v10 = vpop.f32.mrb[2].mxu0 }
 0x152   :  { %v2156_v11 = vpack.c.bf16 %v193_v8, %v193_v8  ;;  %v196_v12 = vadd.f32 %v1484_v6, %v195_v10  ;;  %v1573_v13 = vpop.f32.mrb[3].mxu0  ;;  %v199_v17 = vmul.f32 0.35355338, %v193_v8 }
 0x154   :  { %206 = vrot.lane.b32.xlu0 %v2156_v11, %s1962_s24  ;;  %v2159_v14 = vpack.c.bf16 %v196_v12, %v196_v12  ;;  %v2165_v20 = vpack.c.bf16 %v199_v17, %v199_v17  ;;  %v200_v21 = vmul.f32 0.35355338, %v196_v12 }
 0x156   :  { %v2172_v22 = vpack.c.bf16 %v200_v21, %v200_v21 }
 0x158   :  { %256 = vrot.lane.b32.xlu0 %v2159_v14, %s1962_s24 }
 0x1c6   :  { %v207_v15 = vpop.permute.xlu0 %206 }
 0x1c7   :  { %v213_v16 = vsel %vm208_vm2, %v207_v15, 0 }
 0x1c8   :  { %1575 = vmatpush3.bf16.xpose.msra.mxu1 %v213_v16 }
 0x1c9   :  { %1586 = vmatprep.subr.bf16.mxu1 %v1960_v0 }
 0x1ca   :  { %v257_v18 = vpop.permute.xlu0 %256 }
 0x1cb   :  { %v262_v19 = vsel %vm208_vm2, %v257_v18, 0 }
 0x1cc   :  { %1581 = vmatpush3.bf16.xpose.msra.mxu0 %v262_v19 }
 0x1cd   :  { %1592 = vmatprep.subr.bf16.mxu0 %v1960_v0 }
 0x1cf   :  { %1577 = vmatmul.mubr.msk.bf16.vlgmr.msra.gmra.mrb[0].mxu1 %vm208_vm2, %v2165_v20 }
 0x1d0   :  { %1588 = vmatprep.mubr.msk.bf16.mxu1 %vm1961_vm0, %v1960_v0 }
 0x1d3   :  { %1583 = vmatmul.mubr.msk.bf16.vlgmr.msra.gmra.mrb[4].mxu0 %vm208_vm2, %v2172_v22 }
 0x1d4   :  { %1594 = vmatprep.mubr.msk.bf16.mxu0 %vm1961_vm0, %v1960_v0 }
 0x2a2   :  { %v249_v23 = vpop.f32.mrb[0].mxu1 }
 0x2a3   :  { %v1578_v24 = vpop.f32.mrb[1].mxu1  ;;  %v304_v25 = vsel %vm208_vm2, %v249_v23, -inf }
 0x2a4   :  { %305 = vmax.xlane.f32.xlu1 %v304_v25  ;;  %v252_v26 = vpop.f32.mrb[2].mxu1 }
 0x2a5   :  { %v1579_v27 = vpop.f32.mrb[3].mxu1 }
 0x2a6   :  { %v298_v28 = vpop.f32.mrb[4].mxu0 }
 0x2a7   :  { %v1584_v29 = vpop.f32.mrb[5].mxu0  ;;  %v307_v30 = vsel %vm208_vm2, %v298_v28, -inf }
 0x2a8   :  { %308 = vmax.xlane.f32.xlu1 %v307_v30  ;;  %v301_v31 = vpop.f32.mrb[6].mxu0 }
 0x2a9   :  { %v1585_v32 = vpop.f32.mrb[7].mxu0 }
 0x2b9   :  { %328 = vrot.lane.b32.xlu1 %v2156_v11, %s1951_s28 }
 0x2bd   :  { %377 = vrot.lane.b32.xlu1 %v2159_v14, %s1951_s28  ;;  %s1964_s28 = smov 120  }
 0x2c1   :  { %428 = vrot.lane.b32.xlu1 %v2156_v11, %s1963_s2 }
 0x331   :  { %v306_v33 = vpop.xlane.xlu1 %305 }
 0x332   :  { %v310_v34 = vsub.f32 %v249_v23, %v306_v33 }
 0x334   :  { %v312_v35 = vmul.f32 1.442695, %v310_v34 }
 0x335   :  { %v309_v36 = vpop.xlane.xlu1 %308 }
 0x336   :  { %1742 = vpow2.f32 %v312_v35  ;;  %v311_v37 = vsub.f32 %v298_v28, %v309_v36 }
 0x338   :  { %v314_v38 = vmul.f32 1.442695, %v311_v37 }
 0x339   :  { %v329_v39 = vpop.permute.xlu1 %328 }
 0x33a   :  { %1744 = vpow2.f32 %v314_v38  ;;  %v335_v40 = vsel %vm333_vm3, %v329_v39, 0 }
 0x33b   :  { %1587 = vmatpush3.bf16.msra.mxu1 %v335_v40 }
 0x33c   :  { %1598 = vmatprep.subr.bf16.mxu1 %v1960_v0 }
 0x33d   :  { %v378_v41 = vpop.permute.xlu1 %377 }
 0x33e   :  { %v383_v42 = vsel %vm333_vm3, %v378_v41, 0 }
 0x33f   :  { %1593 = vmatpush3.bf16.msra.mxu0 %v383_v42 }
 0x340   :  { %v1743_v43 = vpop.eup %1742  ;;  %1604 = vmatprep.subr.bf16.mxu0 %v1960_v0 }
 0x341   :  { %v316_v44 = vsel %vm208_vm2, %v1743_v43, 0.0  ;;  %v429_v47 = vpop.permute.xlu1 %428 }
 0x342   :  { %317 = vadd.xlane.f32.xlu0 %v316_v44  ;;  %v434_v54 = vsel %vm208_vm2, %v429_v47, 0 }
 0x344   :  { %v1745_v45 = vpop.eup %1744 }
 0x345   :  { %v319_v46 = vsel %vm208_vm2, %v1745_v45, 0.0 }
 0x346   :  { %320 = vadd.xlane.f32.xlu1 %v319_v46 }
 0x357   :  { %479 = vrot.lane.b32.xlu1 %v2159_v14, %s1963_s2 }
 0x358   :  { %426 = vrot.lane.b32.xlu0 %v2165_v20, %s1964_s28 }
 0x35b   :  { %477 = vrot.lane.b32.xlu1 %v2172_v22, %s1964_s28 }
 0x3cf   :  { %v318_v48 = vpop.xlane.xlu0 %317 }
 0x3d0   :  { %1746 = vrcp.f32 %v318_v48 }
 0x3d3   :  { %v321_v49 = vpop.xlane.xlu1 %320  ;;  %v427_v59 = vpop.permute.xlu0 %426 }
 0x3d4   :  { %1748 = vrcp.f32 %v321_v49 }
 0x3d7   :  { %v480_v56 = vpop.permute.xlu1 %479 }
 0x3d8   :  { %v485_v58 = vsel %vm208_vm2, %v480_v56, 0 }
 0x3da   :  { %v1747_v50 = vpop.eup %1746 }
 0x3db   :  { %v323_v51 = vmul.f32 %v1747_v50, %v1743_v43  ;;  %v478_v60 = vpop.permute.xlu1 %477 }
 0x3dd   :  { %v326_v52 = vpack.c.bf16 %v323_v51, %v323_v51 }
 0x3de   :  { %v1749_v53 = vpop.eup %1748 }
 0x3df   :  { %v325_v55 = vmul.f32 %v1749_v53, %v1745_v45  ;;  %1589 = vmatmul.mubr.msk.bf16.vlgmr.msra.gmra.mrb[4].mxu1 %vm208_vm2, %v326_v52 }
 0x3e0   :  { %1599 = vmatpush3.bf16.xpose.msra.mxu1 %v434_v54  ;;  %1600 = vmatprep.mubr.msk.bf16.mxu1 %vm1961_vm0, %v1960_v0 }
 0x3e1   :  { %v327_v57 = vpack.c.bf16 %v325_v55, %v325_v55  ;;  %1610 = vmatprep.subr.bf16.mxu1 %v1960_v0 }
 0x3e3   :  { %1595 = vmatmul.mubr.msk.bf16.vlgmr.msra.gmra.mrb[8].mxu0 %vm208_vm2, %v327_v57 }
 0x3e4   :  { %1605 = vmatpush3.bf16.xpose.msra.mxu0 %v485_v58  ;;  %1606 = vmatprep.mubr.msk.bf16.mxu0 %vm1961_vm0, %v1960_v0 }
 0x3e5   :  { %1616 = vmatprep.subr.bf16.mxu0 %v1960_v0 }
 0x3e7   :  { %1601 = vmatmul.mubr.msk.bf16.vlgmr.msra.gmra.mrb[8].mxu1 %vm208_vm2, %v427_v59 }
 0x3e8   :  { %1612 = vmatprep.mubr.msk.bf16.mxu1 %vm1961_vm0, %v1960_v0 }
 0x3eb   :  { %1607 = vmatmul.mubr.msk.bf16.vlgmr.msra.gmra.mrb[12].mxu0 %vm208_vm2, %v478_v60 }
 0x3ec   :  { %1618 = vmatprep.mubr.msk.bf16.mxu0 %vm1961_vm0, %v1960_v0 }
 0x4b2   :  { %v2210_v61 = vpop.f32.mrb[4].mxu1 }
 0x4b3   :  { %v1590_v62 = vpop.f32.mrb[5].mxu1 }
 0x4b4   :  { %v374_v63 = vpop.f32.mrb[6].mxu1 }
 0x4b5   :  { %v1591_v1 = vpop.f32.mrb[7].mxu1 }
 0x4b6   :  { %v2212_v2 = vpop.f32.mrb[8].mxu0 }
 0x4b7   :  { %v1596_v5 = vpop.f32.mrb[9].mxu0 }
 0x4b8   :  { %v422_v6 = vpop.f32.mrb[10].mxu0 }
 0x4b9   :  { %v1597_v7 = vpop.f32.mrb[11].mxu0 }
 0x4ba   :  { %v470_v8 = vpop.f32.mrb[8].mxu1 }
 0x4bb   :  { %v1602_v9 = vpop.f32.mrb[9].mxu1  ;;  %v527_v10 = vsel %vm208_vm2, %v470_v8, -inf }
 0x4bc   :  { %528 = vmax.xlane.f32.xlu1 %v527_v10  ;;  %v473_v12 = vpop.f32.mrb[10].mxu1 }
 0x4bd   :  { %v1603_v13 = vpop.f32.mrb[11].mxu1 }
 0x4be   :  { %v521_v15 = vpop.f32.mrb[12].mxu0 }
 0x4bf   :  { %v1608_v16 = vpop.f32.mrb[13].mxu0  ;;  %v530_v17 = vsel %vm208_vm2, %v521_v15, -inf }
 0x4c0   :  { %531 = vmax.xlane.f32.xlu0 %v530_v17  ;;  %v524_v18 = vpop.f32.mrb[14].mxu0 }
 0x4c1   :  { %v1609_v19 = vpop.f32.mrb[15].mxu0 }
 0x4cd   :  { %551 = vrot.lane.b32.xlu1 %v2156_v11, %s1965_s25 }
 0x4d1   :  { %649 = vrot.lane.b32.xlu1 %v2156_v11, %s1966_s3 }
 0x4d6   :  { %599 = vrot.lane.b32.xlu0 %v2159_v14, %s1965_s25 }
 0x4da   :  { %647 = vrot.lane.b32.xlu0 %v2165_v20, %s1967_s29 }
 0x549   :  { %v529_v21 = vpop.xlane.xlu1 %528 }
 0x54a   :  { %v533_v23 = vsub.f32 %v470_v8, %v529_v21 }
 0x54c   :  { %v535_v24 = vmul.f32 1.442695, %v533_v23 }
 0x54d   :  { %v552_v25 = vpop.permute.xlu1 %551  ;;  %v532_v26 = vpop.xlane.xlu0 %531 }
 0x54e   :  { %1750 = vpow2.f32 %v535_v24  ;;  %v557_v27 = vsel %vm333_vm3, %v552_v25, 0  ;;  %v534_v28 = vsub.f32 %v521_v15, %v532_v26 }
 0x54f   :  { %1611 = vmatpush3.bf16.msra.mxu1 %v557_v27 }
 0x550   :  { %v537_v29 = vmul.f32 1.442695, %v534_v28  ;;  %1622 = vmatprep.subr.bf16.mxu1 %v1960_v0 }
 0x551   :  { %v600_v30 = vpop.permute.xlu0 %599  ;;  %v650_v36 = vpop.permute.xlu1 %649 }
 0x552   :  { %1752 = vpow2.f32 %v537_v29  ;;  %v605_v31 = vsel %vm333_vm3, %v600_v30, 0  ;;  %v655_v43 = vsel %vm208_vm2, %v650_v36, 0 }
 0x553   :  { %1617 = vmatpush3.bf16.msra.mxu0 %v605_v31 }
 0x554   :  { %1628 = vmatprep.subr.bf16.mxu0 %v1960_v0 }
 0x555   :  { %v648_v48 = vpop.permute.xlu0 %647 }
 0x558   :  { %v1751_v32 = vpop.eup %1750 }
 0x559   :  { %v539_v33 = vsel %vm208_vm2, %v1751_v32, 0.0 }
 0x55a   :  { %540 = vadd.xlane.f32.xlu1 %v539_v33 }
 0x55c   :  { %v1753_v34 = vpop.eup %1752 }
 0x55d   :  { %v542_v35 = vsel %vm208_vm2, %v1753_v34, 0.0 }
 0x55e   :  { %543 = vadd.xlane.f32.xlu1 %v542_v35 }
 0x56f   :  { %699 = vrot.lane.b32.xlu1 %v2159_v14, %s1966_s3 }
 0x573   :  { %697 = vrot.lane.b32.xlu1 %v2172_v22, %s1967_s29  ;;  %s1974_s29 = smov [#allocation13]  }
 0x5e7   :  { %v541_v37 = vpop.xlane.xlu1 %540 }
 0x5e8   :  { %1754 = vrcp.f32 %v541_v37 }
 0x5eb   :  { %v544_v38 = vpop.xlane.xlu1 %543 }
 0x5ec   :  { %1756 = vrcp.f32 %v544_v38 }
 0x5ef   :  { %v700_v45 = vpop.permute.xlu1 %699 }
 0x5f0   :  { %v705_v47 = vsel %vm208_vm2, %v700_v45, 0 }
 0x5f2   :  { %v1755_v39 = vpop.eup %1754 }
 0x5f3   :  { %v546_v40 = vmul.f32 %v1755_v39, %v1751_v32  ;;  %v698_v49 = vpop.permute.xlu1 %697 }
 0x5f5   :  { %v549_v41 = vpack.c.bf16 %v546_v40, %v546_v40 }
 0x5f6   :  { %v1757_v42 = vpop.eup %1756 }
 0x5f7   :  { %v548_v44 = vmul.f32 %v1757_v42, %v1753_v34  ;;  %1613 = vmatmul.mubr.msk.bf16.vlgmr.msra.gmra.mrb[12].mxu1 %vm208_vm2, %v549_v41 }
 0x5f8   :  { %1623 = vmatpush3.bf16.xpose.msra.mxu1 %v655_v43  ;;  %1624 = vmatprep.mubr.msk.bf16.mxu1 %vm1961_vm0, %v1960_v0 }
 0x5f9   :  { %v550_v46 = vpack.c.bf16 %v548_v44, %v548_v44  ;;  %1634 = vmatprep.subr.bf16.mxu1 %v1960_v0 }
 0x5fb   :  { %1619 = vmatmul.mubr.msk.bf16.vlgmr.msra.gmra.mrb[16].mxu0 %vm208_vm2, %v550_v46 }
 0x5fc   :  { %1629 = vmatpush3.bf16.xpose.msra.mxu0 %v705_v47  ;;  %1630 = vmatprep.mubr.msk.bf16.mxu0 %vm1961_vm0, %v1960_v0 }
 0x5fd   :  { %1640 = vmatprep.subr.bf16.mxu0 %v1960_v0 }
 0x5ff   :  { %1625 = vmatmul.mubr.msk.bf16.vlgmr.msra.gmra.mrb[16].mxu1 %vm208_vm2, %v648_v48 }
 0x600   :  { %1636 = vmatprep.mubr.msk.bf16.mxu1 %vm1961_vm0, %v1960_v0 }
 0x603   :  { %1631 = vmatmul.mubr.msk.bf16.vlgmr.msra.gmra.mrb[20].mxu0 %vm208_vm2, %v698_v49 }
 0x604   :  { %1642 = vmatprep.mubr.msk.bf16.mxu0 %vm1961_vm0, %v1960_v0 }
 0x6ca   :  { %v2244_v50 = vpop.f32.mrb[12].mxu1 }
 0x6cb   :  { %v1614_v51 = vpop.f32.mrb[13].mxu1 }
 0x6cc   :  { %v596_v52 = vpop.f32.mrb[14].mxu1 }
 0x6cd   :  { %v1615_v53 = vpop.f32.mrb[15].mxu1 }
 0x6ce   :  { %v2246_v54 = vpop.f32.mrb[16].mxu0 }
 0x6cf   :  { %v1719_v55 = vpack.i.bf16 %v2246_v54, %v2244_v50  ;;  %v1620_v56 = vpop.f32.mrb[17].mxu0 }
 0x6d0   :  { %v644_v57 = vpop.f32.mrb[18].mxu0 }
 0x6d1   :  { %v1621_v58 = vpop.f32.mrb[19].mxu0 }
 0x6d2   :  { %v691_v59 = vpop.f32.mrb[16].mxu1 }
 0x6d3   :  { %v1626_v60 = vpop.f32.mrb[17].mxu1  ;;  %v747_v62 = vsel %vm208_vm2, %v691_v59, -inf }
 0x6d4   :  { %748 = vmax.xlane.f32.xlu0 %v747_v62  ;;  %v694_v63 = vpop.f32.mrb[18].mxu1 }
 0x6d5   :  { %v1627_v1 = vpop.f32.mrb[19].mxu1 }
 0x6d6   :  { %v741_v5 = vpop.f32.mrb[20].mxu0 }
 0x6d7   :  { %v1632_v6 = vpop.f32.mrb[21].mxu0  ;;  %v750_v7 = vsel %vm208_vm2, %v741_v5, -inf }
 0x6d8   :  { %751 = vmax.xlane.f32.xlu1 %v750_v7  ;;  %v744_v8 = vpop.f32.mrb[22].mxu0 }
 0x6d9   :  { %v1633_v9 = vpop.f32.mrb[23].mxu0 }
 0x6e9   :  { %771 = vrot.lane.b32.xlu1 %v2156_v11, %s1968_s30 }
 0x6ed   :  { %869 = vrot.lane.b32.xlu1 %v2156_v11, %s1969_s26 }
 0x6f1   :  { %919 = vrot.lane.b32.xlu1 %v2159_v14, %s1969_s26 }
 0x6f5   :  { %917 = vrot.lane.b32.xlu1 %v2172_v22, %s1970_s0 }
 0x761   :  { %v749_v10 = vpop.xlane.xlu0 %748 }
 0x762   :  { %v753_v12 = vsub.f32 %v691_v59, %v749_v10 }
 0x764   :  { %v755_v13 = vmul.f32 1.442695, %v753_v12 }
 0x765   :  { %v752_v15 = vpop.xlane.xlu1 %751 }
 0x766   :  { %1758 = vpow2.f32 %v755_v13  ;;  %v754_v16 = vsub.f32 %v741_v5, %v752_v15 }
 0x768   :  { %v757_v17 = vmul.f32 1.442695, %v754_v16 }
 0x769   :  { %v772_v18 = vpop.permute.xlu1 %771 }
 0x76a   :  { %1760 = vpow2.f32 %v757_v17  ;;  %v777_v19 = vsel %vm333_vm3, %v772_v18, 0 }
 0x76b   :  { %1635 = vmatpush3.bf16.msra.mxu1 %v777_v19 }
 0x76c   :  { %1646 = vmatprep.subr.bf16.mxu1 %v1960_v0 }
 0x76d   :  { %v870_v30 = vpop.permute.xlu1 %869 }
 0x76e   :  { %v875_v34 = vsel %vm208_vm2, %v870_v30, 0 }
 0x770   :  { %v1759_v21 = vpop.eup %1758 }
 0x771   :  { %v759_v23 = vsel %vm208_vm2, %v1759_v21, 0.0 }
 0x772   :  { %760 = vadd.xlane.f32.xlu0 %v759_v23 }
 0x774   :  { %v1761_v24 = vpop.eup %1760 }
 0x775   :  { %v762_v22 = vsel %vm208_vm2, %v1761_v24, 0.0 }
 0x776   :  { %763 = vadd.xlane.f32.xlu0 %v762_v22  ;;  %v1737_v22 = vld [vmem:[#allocation7 + $0x8] sm:$0xff]  }
 0x78c   :  { %819 = vrot.lane.b32.xlu0 %v2159_v14, %s1968_s30  ;;  %s1469_s30 = sshll.u32 %s1974_s29, 4  ;;  %s1470_s30 = int_to_ptr.vmem [resolvable:$true] %s1469_s30 }
 0x78d   :  { %s1918_s26 = scalar_lea.vmem %s1470_s30, 256  ;;  %p1923_p7 = scmp.lt.s32.totalorder %s1470_s30, %s1470_s30 }
 0x78e   :  { %p1919_p6 = scmp.ne.s32.totalorder %s1470_s30, %s1918_s26  ;;  %p1924_p8 = scmp.lt.s32.totalorder %s1918_s26, %s1918_s26 }
 0x790   :  { %867 = vrot.lane.b32.xlu0 %v2165_v20, %s1970_s0  ;;  %v920_v20 = vpop.permute.xlu1 %919  ;;  %p1925_p9 = por %p1924_p8, %p1923_p7 }
 0x791   :  { %v925_v37 = vsel %vm208_vm2, %v920_v20, 0 }
 0x792   :  { %p1926_p10 = pnand %p1925_p9, %p1919_p6 }
 0x794   :  { %v918_v39 = vpop.permute.xlu1 %917 }
 0x7ff   :  { %v761_v25 = vpop.xlane.xlu0 %760 }
 0x800   :  { %1762 = vrcp.f32 %v761_v25 }
 0x803   :  { %v764_v26 = vpop.xlane.xlu0 %763 }
 0x804   :  { %1764 = vrcp.f32 %v764_v26 }
 0x807   :  { %v820_v27 = vpop.permute.xlu0 %819 }
 0x808   :  { %v825_v28 = vsel %vm333_vm3, %v820_v27, 0 }
 0x809   :  { %1641 = vmatpush3.bf16.msra.mxu0 %v825_v28 }
 0x80a   :  { %v1763_v29 = vpop.eup %1762  ;;  %1652 = vmatprep.subr.bf16.mxu0 %v1960_v0 }
 0x80b   :  { %v766_v31 = vmul.f32 %v1763_v29, %v1759_v21  ;;  %v868_v38 = vpop.permute.xlu0 %867 }
 0x80d   :  { %v769_v32 = vpack.c.bf16 %v766_v31, %v766_v31 }
 0x80e   :  { %v1765_v33 = vpop.eup %1764 }
 0x80f   :  { %v768_v35 = vmul.f32 %v1765_v33, %v1761_v24  ;;  %1637 = vmatmul.mubr.msk.bf16.vlgmr.msra.gmra.mrb[20].mxu1 %vm208_vm2, %v769_v32  ;;  %v1736_v24 = vld [vmem:[#allocation7] sm:$0xff]  }
 0x810   :  { %1647 = vmatpush3.bf16.xpose.msra.mxu1 %v875_v34  ;;  %1648 = vmatprep.mubr.msk.bf16.mxu1 %vm1961_vm0, %v1960_v0 }
 0x811   :  { %v770_v36 = vpack.c.bf16 %v768_v35, %v768_v35  ;;  %1658 = vmatprep.subr.bf16.mxu1 %v1960_v0 }
 0x813   :  { %1643 = vmatmul.mubr.msk.bf16.vlgmr.msra.gmra.mrb[24].mxu0 %vm208_vm2, %v770_v36 }
 0x814   :  { %1653 = vmatpush3.bf16.xpose.msra.mxu0 %v925_v37  ;;  %1654 = vmatprep.mubr.msk.bf16.mxu0 %vm1961_vm0, %v1960_v0 }
 0x815   :  { %1664 = vmatprep.subr.bf16.mxu0 %v1960_v0 }
 0x817   :  { %1649 = vmatmul.mubr.msk.bf16.vlgmr.msra.gmra.mrb[24].mxu1 %vm208_vm2, %v868_v38 }
 0x818   :  { %1660 = vmatprep.mubr.msk.bf16.mxu1 %vm1961_vm0, %v1960_v0 }
 0x81b   :  { %1655 = vmatmul.mubr.msk.bf16.vlgmr.msra.gmra.mrb[28].mxu0 %vm208_vm2, %v918_v39 }
 0x81c   :  { %1666 = vmatprep.mubr.msk.bf16.mxu0 %vm1961_vm0, %v1960_v0 }
 0x8e2   :  { %v813_v40 = vpop.f32.mrb[20].mxu1 }
 0x8e3   :  { %v1638_v41 = vpop.f32.mrb[21].mxu1 }
 0x8e4   :  { %v816_v42 = vpop.f32.mrb[22].mxu1 }
 0x8e5   :  { %v1639_v43 = vpop.f32.mrb[23].mxu1 }
 0x8e6   :  { %v861_v44 = vpop.f32.mrb[24].mxu0 }
 0x8e7   :  { %v1724_v45 = vpack.i.bf16 %v861_v44, %v813_v40  ;;  %v1644_v46 = vpop.f32.mrb[25].mxu0 }
 0x8e8   :  { %v864_v47 = vpop.f32.mrb[26].mxu0 }
 0x8e9   :  { %v1645_v48 = vpop.f32.mrb[27].mxu0 }
 0x8ea   :  { %v911_v49 = vpop.f32.mrb[24].mxu1 }
 0x8eb   :  { %v1650_v51 = vpop.f32.mrb[25].mxu1  ;;  %v967_v52 = vsel %vm208_vm2, %v911_v49, -inf }
 0x8ec   :  { %968 = vmax.xlane.f32.xlu0 %v967_v52  ;;  %v914_v53 = vpop.f32.mrb[26].mxu1 }
 0x8ed   :  { %v1651_v56 = vpop.f32.mrb[27].mxu1 }
 0x8ee   :  { %v961_v57 = vpop.f32.mrb[28].mxu0 }
 0x8ef   :  { %v1656_v58 = vpop.f32.mrb[29].mxu0  ;;  %v970_v59 = vsel %vm208_vm2, %v961_v57, -inf }
 0x8f0   :  { %971 = vmax.xlane.f32.xlu1 %v970_v59  ;;  %v964_v60 = vpop.f32.mrb[30].mxu0 }
 0x8f1   :  { %v1657_v62 = vpop.f32.mrb[31].mxu0 }
 0x901   :  { %991 = vrot.lane.b32.xlu1 %v2156_v11, %s1971_s21 }
 0x905   :  { %1720 = vrot.lane.b32.xlu1 %v1719_v55, %s1956_s18 }
 0x909   :  { %1725 = vrot.lane.b32.xlu1 %v1724_v45, %s1972_s27 }
 0x979   :  { %v969_v63 = vpop.xlane.xlu0 %968 }
 0x97a   :  { %v973_v1 = vsub.f32 %v911_v49, %v969_v63  ;;  %v1504_v49 = vld [vmem:[%s2378_s4] ss:$0 sm:$0xff] }
 0x97c   :  { %v975_v5 = vmul.f32 1.442695, %v973_v1 }
 0x97d   :  { %v972_v6 = vpop.xlane.xlu1 %971 }
 0x97e   :  { %1766 = vpow2.f32 %v975_v5  ;;  %v974_v7 = vsub.f32 %v961_v57, %v972_v6 }
 0x980   :  { %v977_v8 = vmul.f32 1.442695, %v974_v7 }
 0x981   :  { %v992_v9 = vpop.permute.xlu1 %991 }
 0x982   :  { %1768 = vpow2.f32 %v977_v8  ;;  %v997_v10 = vsel %vm333_vm3, %v992_v9, 0 }
 0x983   :  { %1659 = vmatpush3.bf16.msra.mxu1 %v997_v10 }
 0x984   :  { %1670 = vmatprep.subr.bf16.mxu1 %v1960_v0 }
 0x985   :  { %v1721_v34 = vpop.permute.xlu1 %1720 }
 0x986   :  { %v1723_v20 = vunpack.i.h.bf16 %v1721_v34  ;;  %v1722_v36 = vunpack.i.l.bf16 %v1721_v34 }
 0x988   :  { %v1767_v11 = vpop.eup %1766  ;;  %v1112_v40 = vsel %vm208_vm2, %v2212_v2, %v1723_v20  ;;  %v1111_v41 = vsel %vm208_vm2, %v2210_v61, %v1722_v36 }
 0x989   :  { %v979_v50 = vsel %vm208_vm2, %v1767_v11, 0.0  ;;  %v1726_v35 = vpop.permute.xlu1 %1725 }
 0x98a   :  { %980 = vadd.xlane.f32.xlu0 %v979_v50  ;;  %v1728_v37 = vunpack.i.h.bf16 %v1726_v35  ;;  %v1727_v38 = vunpack.i.l.bf16 %v1726_v35 }
 0x98c   :  { %v1769_v54 = vpop.eup %1768  ;;  %v1114_v44 = vsel %vm1113_vm4, %v1111_v41, %v1727_v38  ;;  %v1115_v45 = vsel %vm1113_vm4, %v1112_v40, %v1728_v37 }
 0x98d   :  { %v982_v55 = vsel %vm208_vm2, %v1769_v54, 0.0 }
 0x98e   :  { %983 = vadd.xlane.f32.xlu0 %v982_v55 }
 0x9a4   :  { %1039 = vrot.lane.b32.xlu0 %v2159_v14, %s1971_s21 }
 0xa17   :  { %v981_v12 = vpop.xlane.xlu0 %980 }
 0xa18   :  { %1770 = vrcp.f32 %v981_v12 }
 0xa1b   :  { %v984_v13 = vpop.xlane.xlu0 %983 }
 0xa1c   :  { %1772 = vrcp.f32 %v984_v13 }
 0xa1f   :  { %v1040_v15 = vpop.permute.xlu0 %1039 }
 0xa20   :  { %v1045_v16 = vsel %vm333_vm3, %v1040_v15, 0 }
 0xa21   :  { %1665 = vmatpush3.bf16.msra.mxu0 %v1045_v16 }
 0xa22   :  { %v1771_v17 = vpop.eup %1770  ;;  %1678 = vmatprep.subr.bf16.mxu0 %v1960_v0 }
 0xa23   :  { %v986_v18 = vmul.f32 %v1771_v17, %v1767_v11  ;;  %v1739_v11 = vld [vmem:[%s2381_s7 + $0x8] sm:$0xff]   ;;  %v1508_v17 = vld [vmem:[#allocation8] ss:$0 sm:$0xff] }
 0xa25   :  { %v989_v19 = vpack.c.bf16 %v986_v18, %v986_v18 }
 0xa26   :  { %v1773_v21 = vpop.eup %1772 }
 0xa27   :  { %v988_v23 = vmul.f32 %v1773_v21, %v1769_v54  ;;  %1661 = vmatmul.mubr.msk.bf16.vlgmr.msra.gmra.mrb[28].mxu1 %vm208_vm2, %v989_v19 }
 0xa28   :  { %1674 = vmatprep.mubr.msk.bf16.mxu1 %vm1961_vm0, %v1960_v0  ;;  %1671 = vmatpush3.bf16.msra.mxu1 %v1736_v24 }
 0xa29   :  { %v990_v14 = vpack.c.bf16 %v988_v23, %v988_v23  ;;  %1672 = vmatprep.subr.bf16.mxu1 %v1960_v0 }
 0xa2b   :  { %1667 = vmatmul.mubr.msk.bf16.vlgmr.msra.gmra.mrb[32].mxu0 %vm208_vm2, %v990_v14  ;;  %v1509_v14 = vld [vmem:[#allocation10] ss:$0 sm:$0xff] }
 0xa2c   :  { %1682 = vmatprep.mubr.msk.bf16.mxu0 %vm1961_vm0, %v1960_v0  ;;  %1673 = vmatpush3.bf16.msra.mxu1 %v1737_v22 }
 0xa2d   :  { %1686 = vmatprep.subr.bf16.mxu1 %v1960_v0 }
 0xafa   :  { %v1033_v25 = vpop.f32.mrb[28].mxu1 }
 0xafb   :  { %v1662_v26 = vpop.f32.mrb[29].mxu1 }
 0xafc   :  { %v1036_v27 = vpop.f32.mrb[30].mxu1 }
 0xafd   :  { %v1663_v28 = vpop.f32.mrb[31].mxu1  ;;  %v1740_v27 = vld [vmem:[%s2383_s9] sm:$0xff]  }
 0xafe   :  { %v1081_v29 = vpop.f32.mrb[32].mxu0  ;;  %v1741_v28 = vld [vmem:[%s2383_s9 + $0x8] sm:$0xff]  }
 0xaff   :  { %v1729_v30 = vpack.i.bf16 %v1081_v29, %v1033_v25  ;;  %v1668_v31 = vpop.f32.mrb[33].mxu0  ;;  %v1510_v29 = vld [vmem:[#allocation11] ss:$0 sm:$0xff] }
 0xb00   :  { %v1084_v32 = vpop.f32.mrb[34].mxu0 }
 0xb01   :  { %1730 = vrot.lane.b32.xlu0 %v1729_v30, %s1973_s1  ;;  %v1669_v33 = vpop.f32.mrb[35].mxu0 }
 0xb73   :  { %v1731_v39 = vpop.permute.xlu0 %1730 }
 0xb74   :  { %v1733_v42 = vunpack.i.h.bf16 %v1731_v39  ;;  %v1732_v43 = vunpack.i.l.bf16 %v1731_v39 }
 0xb76   :  { %v1118_v46 = vsel %vm1116_vm5, %v1115_v45, %v1733_v42  ;;  %v1117_v47 = vsel %vm1116_vm5, %v1114_v44, %v1732_v43 }
 0xb77   :  { %v1119_v48 = vpack.c.bf16 %v1118_v46, %v1117_v47 }
 0xb79   :  { %1675 = vmatmul.mubr.msk.bf16.vlgmr.msra.gmra.mrb[32].mxu1 %vm154_vm1, %v1119_v48 }
 0xb7a   :  { %1690 = vmatprep.mubr.msk.bf16.mxu1 %vm1961_vm0, %v1960_v0  ;;  %1687 = vmatpush3.bf16.msra.mxu1 %v1740_v27 }
 0xb7b   :  { %1688 = vmatprep.subr.bf16.mxu1 %v1960_v0 }
 0xb7e   :  { %1689 = vmatpush3.bf16.msra.mxu1 %v1741_v28 }
 0xc4c   :  { %v1180_v2 = vpop.f32.mrb[32].mxu1 }
 0xc4d   :  { %v1181_v51 = vadd.f32 %v1504_v49, %v1180_v2  ;;  %v1676_v52 = vpop.f32.mrb[33].mxu1 }
 0xc4e   :  { %v1183_v61 = vpop.f32.mrb[34].mxu1 }
 0xc4f   :  { %v1184_v53 = vadd.f32 %v1504_v49, %v1183_v61  ;;  %v1677_v56 = vpop.f32.mrb[35].mxu1  ;;  %v1187_v57 = vadd.f32 %v1181_v51, %v2142_v3 }
 0xc51   :  { %v1191_v58 = vsel %vm154_vm1, %v1187_v57, 0.0  ;;  %v1188_v59 = vadd.f32 %v1184_v53, %v2144_v4  ;;  %v1738_v4 = vld [vmem:[%s2381_s7] sm:$0xff]  }
 0xc52   :  { %1192 = vadd.xlane.f32.xlu1 %v1191_v58  ;;  %1679 = vmatpush3.bf16.msra.mxu0 %v1738_v4 }
 0xc53   :  { %v1194_v60 = vsel %vm154_vm1, %v1188_v59, 0.0  ;;  %1680 = vmatprep.subr.bf16.mxu0 %v1960_v0  ;;  %v1514_v0 = vld [vmem:[%s2384_s10] ss:$0 sm:$0xff] }
 0xc54   :  { %1195 = vadd.xlane.f32.xlu0 %v1194_v60 }
 0xc56   :  { %1681 = vmatpush3.bf16.msra.mxu0 %v1739_v11 }
 0xcdf   :  { %v1193_v62 = vpop.xlane.xlu1 %1192 }
 0xce0   :  { %v1198_v63 = vmul.f32 0.03125, %v1193_v62 }
 0xce1   :  { %v1196_v1 = vpop.xlane.xlu0 %1195 }
 0xce2   :  { %v1200_v5 = vsub.f32 %v1187_v57, %v1198_v63  ;;  %v1199_v6 = vmul.f32 0.03125, %v1196_v1 }
 0xce4   :  { %v1201_v7 = vsub.f32 %v1188_v59, %v1199_v6  ;;  %v1202_v8 = vmul.f32 %v1200_v5, %v1200_v5 }
 0xce6   :  { %v1204_v9 = vsel %vm154_vm1, %v1202_v8, 0.0  ;;  %v1203_v10 = vmul.f32 %v1201_v7, %v1201_v7 }
 0xce7   :  { %1205 = vadd.xlane.f32.xlu0 %v1204_v9 }
 0xce8   :  { %v1207_v3 = vsel %vm154_vm1, %v1203_v10, 0.0  ;;  %v1519_v10 = vld [vmem:[%s2386_s12] ss:$0 sm:$0xff] }
 0xce9   :  { %1208 = vadd.xlane.f32.xlu1 %v1207_v3 }
 0xd74   :  { %v1206_v50 = vpop.xlane.xlu0 %1205 }
 0xd75   :  { %v1210_v54 = vmul.f32 0.03125, %v1206_v50 }
 0xd76   :  { %v1209_v55 = vpop.xlane.xlu1 %1208 }
 0xd77   :  { %v1212_v12 = vadd.f32 1e-05, %v1210_v54  ;;  %v1211_v13 = vmul.f32 0.03125, %v1209_v55 }
 0xd79   :  { %1774 = vrsqrt.f32 %v1212_v12  ;;  %v1213_v15 = vadd.f32 1e-05, %v1211_v13 }
 0xd7b   :  { %1776 = vrsqrt.f32 %v1213_v15 }
 0xd83   :  { %v1775_v16 = vpop.eup %1774 }
 0xd84   :  { %v1216_v18 = vmul.f32 %v1775_v16, %v1200_v5 }
 0xd85   :  { %v1777_v19 = vpop.eup %1776 }
 0xd86   :  { %v1224_v21 = vmul.f32 %v1508_v17, %v1216_v18  ;;  %v1217_v23 = vmul.f32 %v1777_v19, %v1201_v7  ;;  %v1518_v7 = vld [vmem:[%s2385_s11] ss:$0 sm:$0xff] }
 0xd88   :  { %v1225_v24 = vmul.f32 %v1508_v17, %v1217_v23  ;;  %v1232_v22 = vadd.f32 %v1509_v14, %v1224_v21 }
 0xd8a   :  { %v1233_v25 = vadd.f32 %v1509_v14, %v1225_v24 }
 0xd8c   :  { %v1234_v26 = vpack.c.bf16 %v1233_v25, %v1232_v22 }
 0xd8e   :  { %1683 = vmatmul.mubr.msk.bf16.vlgmr.msra.gmra.mrb[36].mxu0 %vm154_vm1, %v1234_v26 }
 0xe61   :  { %v1295_v30 = vpop.f32.mrb[36].mxu0 }
 0xe62   :  { %v1296_v31 = vadd.f32 %v1510_v29, %v1295_v30  ;;  %v1684_v32 = vpop.f32.mrb[37].mxu0 }
 0xe63   :  { %v1298_v33 = vpop.f32.mrb[38].mxu0 }
 0xe64   :  { %v1299_v34 = vadd.f32 %v1510_v29, %v1298_v33  ;;  %v1685_v35 = vpop.f32.mrb[39].mxu0  ;;  %v1302_v20 = vmax.f32 %v1296_v31, 0.0  ;;  %v1520_v31 = vld [vmem:[%s2387_s13] ss:$0 sm:$0xff] }
 0xe66   :  { %v1303_v36 = vmax.f32 %v1299_v34, 0.0  ;;  %v1521_v34 = vld [vmem:[%s2388_s14] ss:$0 sm:$0xff] }
 0xe68   :  { %v1304_v37 = vpack.c.bf16 %v1303_v36, %v1302_v20 }
 0xe6a   :  { %1691 = vmatmul.mubr.msk.bf16.vlgmr.msra.gmra.mrb[36].mxu1 %vm154_vm1, %v1304_v37 }
 0xf3d   :  { %v1365_v38 = vpop.f32.mrb[36].mxu1 }
 0xf3e   :  { %v1366_v39 = vadd.f32 %v1514_v0, %v1365_v38  ;;  %v1692_v40 = vpop.f32.mrb[37].mxu1 }
 0xf3f   :  { %v1368_v41 = vpop.f32.mrb[38].mxu1 }
 0xf40   :  { %v1369_v42 = vadd.f32 %v1514_v0, %v1368_v41  ;;  %v1693_v43 = vpop.f32.mrb[39].mxu1  ;;  %v1372_v44 = vadd.f32 %v1366_v39, %v1232_v22 }
 0xf42   :  { %v1376_v45 = vsel %vm154_vm1, %v1372_v44, 0.0  ;;  %v1373_v46 = vadd.f32 %v1369_v42, %v1233_v25 }
 0xf43   :  { %1377 = vadd.xlane.f32.xlu0 %v1376_v45 }
 0xf44   :  { %v1379_v47 = vsel %vm154_vm1, %v1373_v46, 0.0 }
 0xf45   :  { %1380 = vadd.xlane.f32.xlu1 %v1379_v47 }
 0xfd0   :  { %v1378_v48 = vpop.xlane.xlu0 %1377 }
 0xfd1   :  { %v1382_v49 = vmul.f32 0.03125, %v1378_v48 }
 0xfd2   :  { %v1381_v2 = vpop.xlane.xlu1 %1380 }
 0xfd3   :  { %v1384_v51 = vsub.f32 %v1372_v44, %v1382_v49  ;;  %v1383_v52 = vmul.f32 0.03125, %v1381_v2 }
 0xfd5   :  { %v1385_v61 = vsub.f32 %v1373_v46, %v1383_v52  ;;  %v1386_v53 = vmul.f32 %v1384_v51, %v1384_v51 }
 0xfd7   :  { %v1388_v56 = vsel %vm154_vm1, %v1386_v53, 0.0  ;;  %v1387_v57 = vmul.f32 %v1385_v61, %v1385_v61 }
 0xfd8   :  { %1389 = vadd.xlane.f32.xlu0 %v1388_v56 }
 0xfd9   :  { %v1391_v58 = vsel %vm154_vm1, %v1387_v57, 0.0 }
 0xfda   :  { %1392 = vadd.xlane.f32.xlu1 %v1391_v58 }
0x1065   :  { %v1390_v59 = vpop.xlane.xlu0 %1389 }
0x1066   :  { %v1394_v60 = vmul.f32 0.03125, %v1390_v59 }
0x1067   :  { %v1393_v62 = vpop.xlane.xlu1 %1392 }
0x1068   :  { %v1396_v63 = vadd.f32 1e-05, %v1394_v60  ;;  %v1395_v1 = vmul.f32 0.03125, %v1393_v62 }
0x106a   :  { %1778 = vrsqrt.f32 %v1396_v63  ;;  %v1397_v5 = vadd.f32 1e-05, %v1395_v1 }
0x106c   :  { %1780 = vrsqrt.f32 %v1397_v5 }
0x1074   :  { %v1779_v6 = vpop.eup %1778 }
0x1075   :  { %v1400_v8 = vmul.f32 %v1779_v6, %v1384_v51 }
0x1076   :  { %v1781_v9 = vpop.eup %1780 }
0x1077   :  { %v1408_v3 = vmul.f32 %v1518_v7, %v1400_v8  ;;  %v1401_v4 = vmul.f32 %v1781_v9, %v1385_v61 }
0x1079   :  { %v1416_v11 = vadd.f32 %v1519_v10, %v1408_v3  ;;  %v1409_v50 = vmul.f32 %v1518_v7, %v1401_v4 }
0x107b   :  { %v1420_v54 = vsel %vm154_vm1, %v1416_v11, 0.0  ;;  %v1417_v55 = vadd.f32 %v1519_v10, %v1409_v50 }
0x107c   :  { %1421 = vadd.xlane.f32.xlu0 %v1420_v54 }
0x107d   :  { %v1423_v12 = vsel %vm154_vm1, %v1417_v55, 0.0 }
0x107e   :  { %1424 = vadd.xlane.f32.xlu1 %v1423_v12 }
0x1109   :  { %v1422_v13 = vpop.xlane.xlu0 %1421 }
0x110a   :  { %v1426_v15 = vmul.f32 0.03125, %v1422_v13 }
0x110b   :  { %v1425_v16 = vpop.xlane.xlu1 %1424 }
0x110c   :  { %v1428_v17 = vsub.f32 %v1416_v11, %v1426_v15  ;;  %v1427_v18 = vmul.f32 0.03125, %v1425_v16 }
0x110e   :  { %v1429_v19 = vsub.f32 %v1417_v55, %v1427_v18  ;;  %v1430_v21 = vmul.f32 %v1428_v17, %v1428_v17 }
0x1110   :  { %v1432_v23 = vsel %vm154_vm1, %v1430_v21, 0.0  ;;  %v1431_v14 = vmul.f32 %v1429_v19, %v1429_v19 }
0x1111   :  { %1433 = vadd.xlane.f32.xlu0 %v1432_v23 }
0x1112   :  { %v1435_v24 = vsel %vm154_vm1, %v1431_v14, 0.0 }
0x1113   :  { %1436 = vadd.xlane.f32.xlu1 %v1435_v24 }
0x119e   :  { %v1434_v22 = vpop.xlane.xlu0 %1433 }
0x119f   :  { %v1438_v25 = vmul.f32 0.03125, %v1434_v22 }
0x11a0   :  { %v1437_v26 = vpop.xlane.xlu1 %1436 }
0x11a1   :  { %v1440_v27 = vadd.f32 1e-05, %v1438_v25  ;;  %v1439_v28 = vmul.f32 0.03125, %v1437_v26 }
0x11a3   :  { %1782 = vrsqrt.f32 %v1440_v27  ;;  %v1441_v29 = vadd.f32 1e-05, %v1439_v28 }
0x11a5   :  { %1784 = vrsqrt.f32 %v1441_v29 }
0x11ad   :  { %v1783_v30 = vpop.eup %1782 }
0x11ae   :  { %v1444_v32 = vmul.f32 %v1783_v30, %v1428_v17 }
0x11af   :  { %v1785_v33 = vpop.eup %1784 }
0x11b0   :  { %v1445_v35 = vmul.f32 %v1785_v33, %v1429_v19  ;;  %v1452_v20 = vmul.f32 %v1520_v31, %v1444_v32 }
0x11b2   :  { %v1453_v36 = vmul.f32 %v1520_v31, %v1445_v35  ;;  %v1460_v37 = vadd.f32 %v1521_v34, %v1452_v20 }
0x11b4   :  { %v1461_v0 = vadd.f32 %v1521_v34, %v1453_v36  ;;  %1462 = vst.msk [vmem:[#allocation13] sm:$0xff] %vm154_vm1, %v1460_v37 }
0x11b6   :  { %1463 = vst.msk [vmem:[#allocation13 + $0x8] sm:$0xff] %vm154_vm1, %v1461_v0 }
0x11b7   :  { %1929 = shalt.err (!%p1926_p10)
}
0x11b8   :  { %s2392_s0 = sld [smem:[#allocation19_spill]] }
0x11be   :  { %s1930_s21 = scalar_lea.hbm %s2392_s0, 256 }
0x11bf   :  { %p1931_p11 = scmp.ne.s32.totalorder %s2392_s0, %s1930_s21  ;;  %p1934_p12 = scmp.lt.u32.totalorder %s1930_s21, %s2392_s0 }
0x11c1   :  { %p1936_p13 = pnand %p1934_p12, %p1931_p11 }
0x11c3   :  { %1939 = shalt.err (!%p1936_p13)
}
0x11c4   :  { %1475 = dma.vmem_to_hbm [thread:$0]  %s1470_s30, 256, %s2392_s0, [#allocation4], %s1955_s5, %s1955_s5, %s1956_s18  }
0x11c5   :  { %1948 = dma.done.wait [#allocation4], 256  }
0x11c6   :  { %1949 = vsyncadd [#allocation4], 4294967040 }
0x11c7   :  { %1479 = vsyncpa [#allocation3], 1 }
0x11c8   :  { %1480 = vsyncpa [#allocation6], 1 }
0x11c9   :  { %1481 = vsyncpa [#allocation9], 1 }
0x11ca   :  { %1482 = vsyncpa [#allocation12], 1 }
0x11cb   :  { %1483 = vsyncpa [#allocation4], 1 }

</bundles_post_ra>
